<compile_context>
chip_gen: v7x
topology: tpu7x:2x2x1
jax: 0.10.0
libtpu: 0.0.40
codegen_flags: <defaults>
</compile_context>

<pallas_src>
import jax
import jax.numpy as jnp
import numpy as np
from jax import lax
from jax.experimental import pallas as pl
from jax.experimental.pallas import tpu as pltpu

KSIZE = 7
PAD = 3
IN_CH = 2   # [avg, max]


def spatial_attention_kernel(x_ref, t_ref, b_ref, o_ref, pad_ref):
    # x_ref:  (1, C_TILE, H, W)    VMEM  channel tile of one image
    # t_ref:  (IN_CH*KSIZE, W, W)  VMEM  banded Toeplitz conv matrices (resident)
    # b_ref:  (1,)                 SMEM  conv bias
    # o_ref:  (1, 1, H, W)         VMEM  output attention map
    # pad_ref:(IN_CH, H+6, W)      VMEM  H-padded [channel-sum, channel-max]
    c_step = pl.program_id(1)
    n_c = pl.num_programs(1)
    H = o_ref.shape[2]
    W = o_ref.shape[3]

    x = x_ref[0].astype(jnp.float32)            # (C_TILE, H, W)
    blk_sum = jnp.sum(x, axis=0)                # (H, W) partial channel sum
    blk_max = jnp.max(x, axis=0)                # (H, W) partial channel max

    @pl.when(c_step == 0)
    def _init():
        # Zero only the 3-row zero-pad borders (cheap, and done per image so it
        # is safe under megacore partitioning).  Interior is fully overwritten.
        zrows = jnp.zeros((PAD, W), jnp.float32)
        pad_ref[0, 0:PAD, :] = zrows
        pad_ref[1, 0:PAD, :] = zrows
        pad_ref[0, PAD + H:PAD + H + PAD, :] = zrows
        pad_ref[1, PAD + H:PAD + H + PAD, :] = zrows
        pad_ref[0, PAD:PAD + H, :] = blk_sum
        pad_ref[1, PAD:PAD + H, :] = blk_max

    @pl.when(c_step > 0)
    def _accumulate():
        pad_ref[0, PAD:PAD + H, :] = pad_ref[0, PAD:PAD + H, :] + blk_sum
        pad_ref[1, PAD:PAD + H, :] = jnp.maximum(pad_ref[1, PAD:PAD + H, :],
                                                 blk_max)

    @pl.when(c_step == n_c - 1)
    def _finalize():
        # 14 lane-aligned row-band loads feeding 14 MXU matmuls; the kw sweep
        # (and the W zero padding and 1/C mean scale) live inside t_ref.
        acc = jnp.full((H, W), b_ref[0], dtype=jnp.float32)
        for ci in range(IN_CH):
            for kh in range(KSIZE):
                band = pad_ref[ci, kh:kh + H, :]          # (H, W)
                tmat = t_ref[ci * KSIZE + kh]             # (W, W)
                acc = acc + jnp.dot(band, tmat,
                                    preferred_element_type=jnp.float32,
                                    precision=lax.Precision.HIGHEST)
        o_ref[0, 0] = jax.nn.sigmoid(acc).astype(o_ref.dtype)


def _toeplitz_weights(w, num_channels, width):
    """(1,2,7,7) OIHW conv weights -> (14, W, W) banded matrices.

    band[h, :] @ T[c*7+kh] reproduces the zero-padded 7-wide conv along W for
    input-channel c and vertical tap kh.  The 1/C factor of the channel mean is
    folded into the avg-channel (c=0) matrices, so the kernel only accumulates
    the raw channel sum.
    """
    wt = jnp.asarray(w, jnp.float32).reshape(IN_CH, KSIZE, KSIZE)   # (2,7,7)
    j = jnp.arange(width)[:, None]        # input column index
    wc = jnp.arange(width)[None, :]       # output column index
    k_idx = j - wc + PAD                  # which kw tap couples j -> wc
    valid = ((k_idx >= 0) & (k_idx < KSIZE)).astype(jnp.float32)
    k_clamped = jnp.clip(k_idx, 0, KSIZE - 1)
    t = wt[:, :, k_clamped] * valid[None, None]            # (2, 7, W, W)
    t = t.at[0].multiply(1.0 / num_channels)               # fold mean over C
    return t.reshape(IN_CH * KSIZE, width, width)


def _pick_c_tile(C, H, W, itemsize, budget_bytes=8 * 1024 * 1024):
    """Largest divisor of C whose double-buffered input block fits the budget."""
    per_channel = 2 * H * W * itemsize          # x2 for double buffering
    max_tile = max(1, budget_bytes // per_channel)
    if C <= max_tile:
        return C
    for tile in range(int(max_tile), 0, -1):
        if C % tile == 0:
            return tile
    return 1


def spatial_attention(x, w, b):
    """x: (N, C, H, W); w: (1, 2, 7, 7) OIHW; b: (1,)  ->  (N, 1, H, W)."""
    N, C, H, W = x.shape
    c_tile = _pick_c_tile(C, H, W, x.dtype.itemsize)
    n_c = C // c_tile

    t_mats = _toeplitz_weights(w, C, W)                    # (14, W, W) f32
    b_flat = jnp.asarray(b, jnp.float32).reshape(-1)       # (1,)

    # Explicit VMEM budget: double-buffered input block + Toeplitz + scratch
    # + resident output block, capped at v7x's 64 MiB.
    est = (2 * c_tile * H * W * x.dtype.itemsize
           + t_mats.size * 4
           + IN_CH * (H + 2 * PAD) * W * 4
           + 2 * H * W * x.dtype.itemsize
           + (1 << 20))
    vmem_limit = int(min(max(32 * 1024 * 1024, 2 * est), 64 * 1024 * 1024))

    return pl.pallas_call(
        spatial_attention_kernel,
        out_shape=jax.ShapeDtypeStruct((N, 1, H, W), x.dtype),
        grid=(N, n_c),
        in_specs=[
            pl.BlockSpec((1, c_tile, H, W), lambda n, c: (n, c, 0, 0)),
            pl.BlockSpec((IN_CH * KSIZE, W, W), lambda n, c: (0, 0, 0)),
            pl.BlockSpec(memory_space=pltpu.MemorySpace.SMEM),
        ],
        out_specs=pl.BlockSpec((1, 1, H, W), lambda n, c: (n, 0, 0, 0)),
        scratch_shapes=[pltpu.VMEM((IN_CH, H + 2 * PAD, W), jnp.float32)],
        compiler_params=pltpu.CompilerParams(
            dimension_semantics=("parallel", "arbitrary"),
            vmem_limit_bytes=vmem_limit),
    )(x, t_mats, b_flat)


def reference(x, w, b):
    avg = jnp.mean(x, axis=1, keepdims=True)
    mx = jnp.max(x, axis=1, keepdims=True)
    feat = jnp.concatenate([avg, mx], axis=1)
    out = lax.conv_general_dilated(
        feat, w, window_strides=(1, 1), padding=((PAD, PAD), (PAD, PAD)),
        dimension_numbers=("NCHW", "OIHW", "NCHW"),
        precision=lax.Precision.HIGHEST)
    return jax.nn.sigmoid(out + b.reshape(1, -1, 1, 1))


if __name__ == "__main__":
    key = jax.random.PRNGKey(0)
    kx, kw, kb = jax.random.split(key, 3)

    N, C, H, W = 2, 4, 16, 16
    x = jax.random.normal(kx, (N, C, H, W), dtype=jnp.float32)

    # Deterministic conv params (PyTorch-style uniform init bounds).
    fan_in = IN_CH * KSIZE * KSIZE
    bound = 1.0 / np.sqrt(fan_in)
    w = jax.random.uniform(kw, (1, IN_CH, KSIZE, KSIZE), jnp.float32, -bound, bound)
    b = jax.random.uniform(kb, (1,), jnp.float32, -bound, bound)

    out = jax.block_until_ready(spatial_attention(x, w, b))
    ref = jax.block_until_ready(reference(x, w, b))

    assert out.shape == (N, 1, H, W)
    np.testing.assert_allclose(np.asarray(out), np.asarray(ref), atol=1e-4, rtol=1e-4)
    print("KERNEL_OK")
</pallas_src>

<mosaic_0001>
module attributes {stable_mosaic.version = 11 : i64} {
  func.func @spatial_attention_kernel(%arg0: i32, %arg1: i32, %arg2: memref<1x4x16x16xf32, #tpu.memory_space<vmem>>, %arg3: memref<14x16x16xf32, #tpu.memory_space<vmem>>, %arg4: memref<1xf32, #tpu.memory_space<smem>>, %arg5: memref<1x1x16x16xf32, #tpu.memory_space<vmem>>, %arg6: memref<2x22x16xf32, #tpu.memory_space<vmem>>) attributes {dimension_semantics = [#tpu.dimension_semantics<parallel>, #tpu.dimension_semantics<arbitrary>], iteration_bounds = array<i64: 2, 1>, scalar_prefetch = 0 : i64, scratch_operands = 1 : i64, tpu.core_type = #tpu.core_type<tc>, window_params = [{transform_indices = @transform_0, window_bounds = array<i64: 1, 4, 16, 16>}, {pipeline_mode = #tpu.pipeline_mode<synchronous>, transform_indices = @transform_1, window_bounds = array<i64: 14, 16, 16>}, {transform_indices = @transform_2, window_bounds = array<i64: 1>}, {transform_indices = @transform_3, window_bounds = array<i64: 1, 1, 16, 16>}]} {
    %c0 = arith.constant 0 : index
    %c0_0 = arith.constant 0 : index
    %c0_1 = arith.constant 0 : index
    %c0_2 = arith.constant 0 : index
    %0 = vector.load %arg2[%c0, %c0_0, %c0_1, %c0_2] : memref<1x4x16x16xf32, #tpu.memory_space<vmem>>, vector<1x4x16x16xf32>
    %1 = vector.shape_cast %0 : vector<1x4x16x16xf32> to vector<4x16x16xf32>
    %cst = arith.constant dense<0.000000e+00> : vector<16x16xf32>
    %2 = vector.multi_reduction <add>, %1, %cst [0] : vector<4x16x16xf32> to vector<16x16xf32>
    %cst_3 = arith.constant dense<0xFF800000> : vector<16x16xf32>
    %3 = vector.multi_reduction <maximumf>, %1, %cst_3 [0] : vector<4x16x16xf32> to vector<16x16xf32>
    %c0_i32 = arith.constant 0 : i32
    %4 = arith.cmpi eq, %arg1, %c0_i32 : i32
    %5 = arith.extui %4 : i1 to i32
    %c0_i32_4 = arith.constant 0 : i32
    %6 = arith.cmpi ne, %5, %c0_i32_4 : i32
    scf.if %6 {
      %cst_9 = arith.constant 0.000000e+00 : f32
      %13 = vector.broadcast %cst_9 : f32 to vector<3x16xf32>
      %c0_10 = arith.constant 0 : index
      %c0_11 = arith.constant 0 : index
      %c0_12 = arith.constant 0 : index
      %14 = vector.load %arg6[%c0_10, %c0_11, %c0_12] : memref<2x22x16xf32, #tpu.memory_space<vmem>>, vector<1x3x16xf32>
      %15 = vector.shape_cast %14 : vector<1x3x16xf32> to vector<3x16xf32>
      %16 = vector.shape_cast %13 : vector<3x16xf32> to vector<1x3x16xf32>
      tpu.vector_store %arg6[%c0_10, %c0_11, %c0_12], %16 {strides = array<i32>} : memref<2x22x16xf32, #tpu.memory_space<vmem>>, vector<1x3x16xf32>,
      %c1 = arith.constant 1 : index
      %c0_13 = arith.constant 0 : index
      %c0_14 = arith.constant 0 : index
      %17 = vector.load %arg6[%c1, %c0_13, %c0_14] : memref<2x22x16xf32, #tpu.memory_space<vmem>>, vector<1x3x16xf32>
      %18 = vector.shape_cast %17 : vector<1x3x16xf32> to vector<3x16xf32>
      %19 = vector.shape_cast %13 : vector<3x16xf32> to vector<1x3x16xf32>
      tpu.vector_store %arg6[%c1, %c0_13, %c0_14], %19 {strides = array<i32>} : memref<2x22x16xf32, #tpu.memory_space<vmem>>, vector<1x3x16xf32>,
      %c0_15 = arith.constant 0 : index
      %c19 = arith.constant 19 : index
      %c0_16 = arith.constant 0 : index
      %20 = vector.load %arg6[%c0_15, %c19, %c0_16] : memref<2x22x16xf32, #tpu.memory_space<vmem>>, vector<1x3x16xf32>
      %21 = vector.shape_cast %20 : vector<1x3x16xf32> to vector<3x16xf32>
      %22 = vector.shape_cast %13 : vector<3x16xf32> to vector<1x3x16xf32>
      tpu.vector_store %arg6[%c0_15, %c19, %c0_16], %22 {strides = array<i32>} : memref<2x22x16xf32, #tpu.memory_space<vmem>>, vector<1x3x16xf32>,
      %c1_17 = arith.constant 1 : index
      %c19_18 = arith.constant 19 : index
      %c0_19 = arith.constant 0 : index
      %23 = vector.load %arg6[%c1_17, %c19_18, %c0_19] : memref<2x22x16xf32, #tpu.memory_space<vmem>>, vector<1x3x16xf32>
      %24 = vector.shape_cast %23 : vector<1x3x16xf32> to vector<3x16xf32>
      %25 = vector.shape_cast %13 : vector<3x16xf32> to vector<1x3x16xf32>
      tpu.vector_store %arg6[%c1_17, %c19_18, %c0_19], %25 {strides = array<i32>} : memref<2x22x16xf32, #tpu.memory_space<vmem>>, vector<1x3x16xf32>,
      %c0_20 = arith.constant 0 : index
      %c3 = arith.constant 3 : index
      %c0_21 = arith.constant 0 : index
      %26 = vector.load %arg6[%c0_20, %c3, %c0_21] : memref<2x22x16xf32, #tpu.memory_space<vmem>>, vector<1x16x16xf32>
      %27 = vector.shape_cast %26 : vector<1x16x16xf32> to vector<16x16xf32>
      %28 = vector.shape_cast %2 : vector<16x16xf32> to vector<1x16x16xf32>
      tpu.vector_store %arg6[%c0_20, %c3, %c0_21], %28 {strides = array<i32>} : memref<2x22x16xf32, #tpu.memory_space<vmem>>, vector<1x16x16xf32>,
      %c1_22 = arith.constant 1 : index
      %c3_23 = arith.constant 3 : index
      %c0_24 = arith.constant 0 : index
      %29 = vector.load %arg6[%c1_22, %c3_23, %c0_24] : memref<2x22x16xf32, #tpu.memory_space<vmem>>, vector<1x16x16xf32>
      %30 = vector.shape_cast %29 : vector<1x16x16xf32> to vector<16x16xf32>
      %31 = vector.shape_cast %3 : vector<16x16xf32> to vector<1x16x16xf32>
      tpu.vector_store %arg6[%c1_22, %c3_23, %c0_24], %31 {strides = array<i32>} : memref<2x22x16xf32, #tpu.memory_space<vmem>>, vector<1x16x16xf32>,
    } else {
    }
    %c0_i32_5 = arith.constant 0 : i32
    %7 = arith.cmpi sgt, %arg1, %c0_i32_5 : i32
    %8 = arith.extui %7 : i1 to i32
    %c0_i32_6 = arith.constant 0 : i32
    %9 = arith.cmpi ne, %8, %c0_i32_6 : i32
    scf.if %9 {
      %c0_9 = arith.constant 0 : index
      %c3 = arith.constant 3 : index
      %c0_10 = arith.constant 0 : index
      %13 = vector.load %arg6[%c0_9, %c3, %c0_10] : memref<2x22x16xf32, #tpu.memory_space<vmem>>, vector<1x16x16xf32>
      %14 = vector.shape_cast %13 : vector<1x16x16xf32> to vector<16x16xf32>
      %15 = arith.addf %14, %2 : vector<16x16xf32>
      %c0_11 = arith.constant 0 : index
      %c3_12 = arith.constant 3 : index
      %c0_13 = arith.constant 0 : index
      %16 = vector.load %arg6[%c0_11, %c3_12, %c0_13] : memref<2x22x16xf32, #tpu.memory_space<vmem>>, vector<1x16x16xf32>
      %17 = vector.shape_cast %16 : vector<1x16x16xf32> to vector<16x16xf32>
      %18 = vector.shape_cast %15 : vector<16x16xf32> to vector<1x16x16xf32>
      tpu.vector_store %arg6[%c0_11, %c3_12, %c0_13], %18 {strides = array<i32>} : memref<2x22x16xf32, #tpu.memory_space<vmem>>, vector<1x16x16xf32>,
      %c1 = arith.constant 1 : index
      %c3_14 = arith.constant 3 : index
      %c0_15 = arith.constant 0 : index
      %19 = vector.load %arg6[%c1, %c3_14, %c0_15] : memref<2x22x16xf32, #tpu.memory_space<vmem>>, vector<1x16x16xf32>
      %20 = vector.shape_cast %19 : vector<1x16x16xf32> to vector<16x16xf32>
      %21 = arith.maximumf %20, %3 : vector<16x16xf32>
      %c1_16 = arith.constant 1 : index
      %c3_17 = arith.constant 3 : index
      %c0_18 = arith.constant 0 : index
      %22 = vector.load %arg6[%c1_16, %c3_17, %c0_18] : memref<2x22x16xf32, #tpu.memory_space<vmem>>, vector<1x16x16xf32>
      %23 = vector.shape_cast %22 : vector<1x16x16xf32> to vector<16x16xf32>
      %24 = vector.shape_cast %21 : vector<16x16xf32> to vector<1x16x16xf32>
      tpu.vector_store %arg6[%c1_16, %c3_17, %c0_18], %24 {strides = array<i32>} : memref<2x22x16xf32, #tpu.memory_space<vmem>>, vector<1x16x16xf32>,
    } else {
    }
    %c0_i32_7 = arith.constant 0 : i32
    %10 = arith.cmpi eq, %arg1, %c0_i32_7 : i32
    %11 = arith.extui %10 : i1 to i32
    %c0_i32_8 = arith.constant 0 : i32
    %12 = arith.cmpi ne, %11, %c0_i32_8 : i32
    scf.if %12 {
      %c0_9 = arith.constant 0 : index
      %13 = memref.load %arg4[%c0_9] : memref<1xf32, #tpu.memory_space<smem>>
      %14 = vector.broadcast %13 : f32 to vector<16x16xf32>
      %c0_10 = arith.constant 0 : index
      %c0_11 = arith.constant 0 : index
      %c0_12 = arith.constant 0 : index
      %15 = vector.load %arg6[%c0_10, %c0_11, %c0_12] : memref<2x22x16xf32, #tpu.memory_space<vmem>>, vector<1x16x16xf32>
      %16 = vector.shape_cast %15 : vector<1x16x16xf32> to vector<16x16xf32>
      %c0_13 = arith.constant 0 : index
      %c0_14 = arith.constant 0 : index
      %c0_15 = arith.constant 0 : index
      %17 = vector.load %arg3[%c0_13, %c0_14, %c0_15] : memref<14x16x16xf32, #tpu.memory_space<vmem>>, vector<1x16x16xf32>
      %18 = vector.shape_cast %17 : vector<1x16x16xf32> to vector<16x16xf32>
      %cst_16 = arith.constant dense<0.000000e+00> : vector<16x16xf32>
      %19 = tpu.matmul %16, %18, %cst_16 {dimension_numbers = #tpu.dot_dimension_numbers<[1], [0], [0], [1], [0, 0, 1, 1], [], []>, precision = #tpu.contract_precision<fp32>} : vector<16x16xf32>, vector<16x16xf32>, vector<16x16xf32> -> vector<16x16xf32>
      %20 = arith.addf %14, %19 : vector<16x16xf32>
      %c0_17 = arith.constant 0 : index
      %c1 = arith.constant 1 : index
      %c0_18 = arith.constant 0 : index
      %21 = vector.load %arg6[%c0_17, %c1, %c0_18] : memref<2x22x16xf32, #tpu.memory_space<vmem>>, vector<1x16x16xf32>
      %22 = vector.shape_cast %21 : vector<1x16x16xf32> to vector<16x16xf32>
      %c1_19 = arith.constant 1 : index
      %c0_20 = arith.constant 0 : index
      %c0_21 = arith.constant 0 : index
      %23 = vector.load %arg3[%c1_19, %c0_20, %c0_21] : memref<14x16x16xf32, #tpu.memory_space<vmem>>, vector<1x16x16xf32>
      %24 = vector.shape_cast %23 : vector<1x16x16xf32> to vector<16x16xf32>
      %cst_22 = arith.constant dense<0.000000e+00> : vector<16x16xf32>
      %25 = tpu.matmul %22, %24, %cst_22 {dimension_numbers = #tpu.dot_dimension_numbers<[1], [0], [0], [1], [0, 0, 1, 1], [], []>, precision = #tpu.contract_precision<fp32>} : vector<16x16xf32>, vector<16x16xf32>, vector<16x16xf32> -> vector<16x16xf32>
      %26 = arith.addf %20, %25 : vector<16x16xf32>
      %c0_23 = arith.constant 0 : index
      %c2 = arith.constant 2 : index
      %c0_24 = arith.constant 0 : index
      %27 = vector.load %arg6[%c0_23, %c2, %c0_24] : memref<2x22x16xf32, #tpu.memory_space<vmem>>, vector<1x16x16xf32>
      %28 = vector.shape_cast %27 : vector<1x16x16xf32> to vector<16x16xf32>
      %c2_25 = arith.constant 2 : index
      %c0_26 = arith.constant 0 : index
      %c0_27 = arith.constant 0 : index
      %29 = vector.load %arg3[%c2_25, %c0_26, %c0_27] : memref<14x16x16xf32, #tpu.memory_space<vmem>>, vector<1x16x16xf32>
      %30 = vector.shape_cast %29 : vector<1x16x16xf32> to vector<16x16xf32>
      %cst_28 = arith.constant dense<0.000000e+00> : vector<16x16xf32>
      %31 = tpu.matmul %28, %30, %cst_28 {dimension_numbers = #tpu.dot_dimension_numbers<[1], [0], [0], [1], [0, 0, 1, 1], [], []>, precision = #tpu.contract_precision<fp32>} : vector<16x16xf32>, vector<16x16xf32>, vector<16x16xf32> -> vector<16x16xf32>
      %32 = arith.addf %26, %31 : vector<16x16xf32>
      %c0_29 = arith.constant 0 : index
      %c3 = arith.constant 3 : index
      %c0_30 = arith.constant 0 : index
      %33 = vector.load %arg6[%c0_29, %c3, %c0_30] : memref<2x22x16xf32, #tpu.memory_space<vmem>>, vector<1x16x16xf32>
      %34 = vector.shape_cast %33 : vector<1x16x16xf32> to vector<16x16xf32>
      %c3_31 = arith.constant 3 : index
      %c0_32 = arith.constant 0 : index
      %c0_33 = arith.constant 0 : index
      %35 = vector.load %arg3[%c3_31, %c0_32, %c0_33] : memref<14x16x16xf32, #tpu.memory_space<vmem>>, vector<1x16x16xf32>
      %36 = vector.shape_cast %35 : vector<1x16x16xf32> to vector<16x16xf32>
      %cst_34 = arith.constant dense<0.000000e+00> : vector<16x16xf32>
      %37 = tpu.matmul %34, %36, %cst_34 {dimension_numbers = #tpu.dot_dimension_numbers<[1], [0], [0], [1], [0, 0, 1, 1], [], []>, precision = #tpu.contract_precision<fp32>} : vector<16x16xf32>, vector<16x16xf32>, vector<16x16xf32> -> vector<16x16xf32>
      %38 = arith.addf %32, %37 : vector<16x16xf32>
      %c0_35 = arith.constant 0 : index
      %c4 = arith.constant 4 : index
      %c0_36 = arith.constant 0 : index
      %39 = vector.load %arg6[%c0_35, %c4, %c0_36] : memref<2x22x16xf32, #tpu.memory_space<vmem>>, vector<1x16x16xf32>
      %40 = vector.shape_cast %39 : vector<1x16x16xf32> to vector<16x16xf32>
      %c4_37 = arith.constant 4 : index
      %c0_38 = arith.constant 0 : index
      %c0_39 = arith.constant 0 : index
      %41 = vector.load %arg3[%c4_37, %c0_38, %c0_39] : memref<14x16x16xf32, #tpu.memory_space<vmem>>, vector<1x16x16xf32>
      %42 = vector.shape_cast %41 : vector<1x16x16xf32> to vector<16x16xf32>
      %cst_40 = arith.constant dense<0.000000e+00> : vector<16x16xf32>
      %43 = tpu.matmul %40, %42, %cst_40 {dimension_numbers = #tpu.dot_dimension_numbers<[1], [0], [0], [1], [0, 0, 1, 1], [], []>, precision = #tpu.contract_precision<fp32>} : vector<16x16xf32>, vector<16x16xf32>, vector<16x16xf32> -> vector<16x16xf32>
      %44 = arith.addf %38, %43 : vector<16x16xf32>
      %c0_41 = arith.constant 0 : index
      %c5 = arith.constant 5 : index
      %c0_42 = arith.constant 0 : index
      %45 = vector.load %arg6[%c0_41, %c5, %c0_42] : memref<2x22x16xf32, #tpu.memory_space<vmem>>, vector<1x16x16xf32>
      %46 = vector.shape_cast %45 : vector<1x16x16xf32> to vector<16x16xf32>
      %c5_43 = arith.constant 5 : index
      %c0_44 = arith.constant 0 : index
      %c0_45 = arith.constant 0 : index
      %47 = vector.load %arg3[%c5_43, %c0_44, %c0_45] : memref<14x16x16xf32, #tpu.memory_space<vmem>>, vector<1x16x16xf32>
      %48 = vector.shape_cast %47 : vector<1x16x16xf32> to vector<16x16xf32>
      %cst_46 = arith.constant dense<0.000000e+00> : vector<16x16xf32>
      %49 = tpu.matmul %46, %48, %cst_46 {dimension_numbers = #tpu.dot_dimension_numbers<[1], [0], [0], [1], [0, 0, 1, 1], [], []>, precision = #tpu.contract_precision<fp32>} : vector<16x16xf32>, vector<16x16xf32>, vector<16x16xf32> -> vector<16x16xf32>
      %50 = arith.addf %44, %49 : vector<16x16xf32>
      %c0_47 = arith.constant 0 : index
      %c6 = arith.constant 6 : index
      %c0_48 = arith.constant 0 : index
      %51 = vector.load %arg6[%c0_47, %c6, %c0_48] : memref<2x22x16xf32, #tpu.memory_space<vmem>>, vector<1x16x16xf32>
      %52 = vector.shape_cast %51 : vector<1x16x16xf32> to vector<16x16xf32>
      %c6_49 = arith.constant 6 : index
      %c0_50 = arith.constant 0 : index
      %c0_51 = arith.constant 0 : index
      %53 = vector.load %arg3[%c6_49, %c0_50, %c0_51] : memref<14x16x16xf32, #tpu.memory_space<vmem>>, vector<1x16x16xf32>
      %54 = vector.shape_cast %53 : vector<1x16x16xf32> to vector<16x16xf32>
      %cst_52 = arith.constant dense<0.000000e+00> : vector<16x16xf32>
      %55 = tpu.matmul %52, %54, %cst_52 {dimension_numbers = #tpu.dot_dimension_numbers<[1], [0], [0], [1], [0, 0, 1, 1], [], []>, precision = #tpu.contract_precision<fp32>} : vector<16x16xf32>, vector<16x16xf32>, vector<16x16xf32> -> vector<16x16xf32>
      %56 = arith.addf %50, %55 : vector<16x16xf32>
      %c1_53 = arith.constant 1 : index
      %c0_54 = arith.constant 0 : index
      %c0_55 = arith.constant 0 : index
      %57 = vector.load %arg6[%c1_53, %c0_54, %c0_55] : memref<2x22x16xf32, #tpu.memory_space<vmem>>, vector<1x16x16xf32>
      %58 = vector.shape_cast %57 : vector<1x16x16xf32> to vector<16x16xf32>
      %c7 = arith.constant 7 : index
      %c0_56 = arith.constant 0 : index
      %c0_57 = arith.constant 0 : index
      %59 = vector.load %arg3[%c7, %c0_56, %c0_57] : memref<14x16x16xf32, #tpu.memory_space<vmem>>, vector<1x16x16xf32>
      %60 = vector.shape_cast %59 : vector<1x16x16xf32> to vector<16x16xf32>
      %cst_58 = arith.constant dense<0.000000e+00> : vector<16x16xf32>
      %61 = tpu.matmul %58, %60, %cst_58 {dimension_numbers = #tpu.dot_dimension_numbers<[1], [0], [0], [1], [0, 0, 1, 1], [], []>, precision = #tpu.contract_precision<fp32>} : vector<16x16xf32>, vector<16x16xf32>, vector<16x16xf32> -> vector<16x16xf32>
      %62 = arith.addf %56, %61 : vector<16x16xf32>
      %c1_59 = arith.constant 1 : index
      %c1_60 = arith.constant 1 : index
      %c0_61 = arith.constant 0 : index
      %63 = vector.load %arg6[%c1_59, %c1_60, %c0_61] : memref<2x22x16xf32, #tpu.memory_space<vmem>>, vector<1x16x16xf32>
      %64 = vector.shape_cast %63 : vector<1x16x16xf32> to vector<16x16xf32>
      %c8 = arith.constant 8 : index
      %c0_62 = arith.constant 0 : index
      %c0_63 = arith.constant 0 : index
      %65 = vector.load %arg3[%c8, %c0_62, %c0_63] : memref<14x16x16xf32, #tpu.memory_space<vmem>>, vector<1x16x16xf32>
      %66 = vector.shape_cast %65 : vector<1x16x16xf32> to vector<16x16xf32>
      %cst_64 = arith.constant dense<0.000000e+00> : vector<16x16xf32>
      %67 = tpu.matmul %64, %66, %cst_64 {dimension_numbers = #tpu.dot_dimension_numbers<[1], [0], [0], [1], [0, 0, 1, 1], [], []>, precision = #tpu.contract_precision<fp32>} : vector<16x16xf32>, vector<16x16xf32>, vector<16x16xf32> -> vector<16x16xf32>
      %68 = arith.addf %62, %67 : vector<16x16xf32>
      %c1_65 = arith.constant 1 : index
      %c2_66 = arith.constant 2 : index
      %c0_67 = arith.constant 0 : index
      %69 = vector.load %arg6[%c1_65, %c2_66, %c0_67] : memref<2x22x16xf32, #tpu.memory_space<vmem>>, vector<1x16x16xf32>
      %70 = vector.shape_cast %69 : vector<1x16x16xf32> to vector<16x16xf32>
      %c9 = arith.constant 9 : index
      %c0_68 = arith.constant 0 : index
      %c0_69 = arith.constant 0 : index
      %71 = vector.load %arg3[%c9, %c0_68, %c0_69] : memref<14x16x16xf32, #tpu.memory_space<vmem>>, vector<1x16x16xf32>
      %72 = vector.shape_cast %71 : vector<1x16x16xf32> to vector<16x16xf32>
      %cst_70 = arith.constant dense<0.000000e+00> : vector<16x16xf32>
      %73 = tpu.matmul %70, %72, %cst_70 {dimension_numbers = #tpu.dot_dimension_numbers<[1], [0], [0], [1], [0, 0, 1, 1], [], []>, precision = #tpu.contract_precision<fp32>} : vector<16x16xf32>, vector<16x16xf32>, vector<16x16xf32> -> vector<16x16xf32>
      %74 = arith.addf %68, %73 : vector<16x16xf32>
      %c1_71 = arith.constant 1 : index
      %c3_72 = arith.constant 3 : index
      %c0_73 = arith.constant 0 : index
      %75 = vector.load %arg6[%c1_71, %c3_72, %c0_73] : memref<2x22x16xf32, #tpu.memory_space<vmem>>, vector<1x16x16xf32>
      %76 = vector.shape_cast %75 : vector<1x16x16xf32> to vector<16x16xf32>
      %c10 = arith.constant 10 : index
      %c0_74 = arith.constant 0 : index
      %c0_75 = arith.constant 0 : index
      %77 = vector.load %arg3[%c10, %c0_74, %c0_75] : memref<14x16x16xf32, #tpu.memory_space<vmem>>, vector<1x16x16xf32>
      %78 = vector.shape_cast %77 : vector<1x16x16xf32> to vector<16x16xf32>
      %cst_76 = arith.constant dense<0.000000e+00> : vector<16x16xf32>
      %79 = tpu.matmul %76, %78, %cst_76 {dimension_numbers = #tpu.dot_dimension_numbers<[1], [0], [0], [1], [0, 0, 1, 1], [], []>, precision = #tpu.contract_precision<fp32>} : vector<16x16xf32>, vector<16x16xf32>, vector<16x16xf32> -> vector<16x16xf32>
      %80 = arith.addf %74, %79 : vector<16x16xf32>
      %c1_77 = arith.constant 1 : index
      %c4_78 = arith.constant 4 : index
      %c0_79 = arith.constant 0 : index
      %81 = vector.load %arg6[%c1_77, %c4_78, %c0_79] : memref<2x22x16xf32, #tpu.memory_space<vmem>>, vector<1x16x16xf32>
      %82 = vector.shape_cast %81 : vector<1x16x16xf32> to vector<16x16xf32>
      %c11 = arith.constant 11 : index
      %c0_80 = arith.constant 0 : index
      %c0_81 = arith.constant 0 : index
      %83 = vector.load %arg3[%c11, %c0_80, %c0_81] : memref<14x16x16xf32, #tpu.memory_space<vmem>>, vector<1x16x16xf32>
      %84 = vector.shape_cast %83 : vector<1x16x16xf32> to vector<16x16xf32>
      %cst_82 = arith.constant dense<0.000000e+00> : vector<16x16xf32>
      %85 = tpu.matmul %82, %84, %cst_82 {dimension_numbers = #tpu.dot_dimension_numbers<[1], [0], [0], [1], [0, 0, 1, 1], [], []>, precision = #tpu.contract_precision<fp32>} : vector<16x16xf32>, vector<16x16xf32>, vector<16x16xf32> -> vector<16x16xf32>
      %86 = arith.addf %80, %85 : vector<16x16xf32>
      %c1_83 = arith.constant 1 : index
      %c5_84 = arith.constant 5 : index
      %c0_85 = arith.constant 0 : index
      %87 = vector.load %arg6[%c1_83, %c5_84, %c0_85] : memref<2x22x16xf32, #tpu.memory_space<vmem>>, vector<1x16x16xf32>
      %88 = vector.shape_cast %87 : vector<1x16x16xf32> to vector<16x16xf32>
      %c12 = arith.constant 12 : index
      %c0_86 = arith.constant 0 : index
      %c0_87 = arith.constant 0 : index
      %89 = vector.load %arg3[%c12, %c0_86, %c0_87] : memref<14x16x16xf32, #tpu.memory_space<vmem>>, vector<1x16x16xf32>
      %90 = vector.shape_cast %89 : vector<1x16x16xf32> to vector<16x16xf32>
      %cst_88 = arith.constant dense<0.000000e+00> : vector<16x16xf32>
      %91 = tpu.matmul %88, %90, %cst_88 {dimension_numbers = #tpu.dot_dimension_numbers<[1], [0], [0], [1], [0, 0, 1, 1], [], []>, precision = #tpu.contract_precision<fp32>} : vector<16x16xf32>, vector<16x16xf32>, vector<16x16xf32> -> vector<16x16xf32>
      %92 = arith.addf %86, %91 : vector<16x16xf32>
      %c1_89 = arith.constant 1 : index
      %c6_90 = arith.constant 6 : index
      %c0_91 = arith.constant 0 : index
      %93 = vector.load %arg6[%c1_89, %c6_90, %c0_91] : memref<2x22x16xf32, #tpu.memory_space<vmem>>, vector<1x16x16xf32>
      %94 = vector.shape_cast %93 : vector<1x16x16xf32> to vector<16x16xf32>
      %c13 = arith.constant 13 : index
      %c0_92 = arith.constant 0 : index
      %c0_93 = arith.constant 0 : index
      %95 = vector.load %arg3[%c13, %c0_92, %c0_93] : memref<14x16x16xf32, #tpu.memory_space<vmem>>, vector<1x16x16xf32>
      %96 = vector.shape_cast %95 : vector<1x16x16xf32> to vector<16x16xf32>
      %cst_94 = arith.constant dense<0.000000e+00> : vector<16x16xf32>
      %97 = tpu.matmul %94, %96, %cst_94 {dimension_numbers = #tpu.dot_dimension_numbers<[1], [0], [0], [1], [0, 0, 1, 1], [], []>, precision = #tpu.contract_precision<fp32>} : vector<16x16xf32>, vector<16x16xf32>, vector<16x16xf32> -> vector<16x16xf32>
      %98 = arith.addf %92, %97 : vector<16x16xf32>
      %99 = arith.negf %98 : vector<16x16xf32>
      %100 = math.exp %99 : vector<16x16xf32>
      %cst_95 = arith.constant 1.000000e+00 : f32
      %101 = vector.broadcast %cst_95 : f32 to vector<16x16xf32>
      %102 = arith.addf %101, %100 : vector<16x16xf32>
      %103 = arith.divf %101, %102 : vector<16x16xf32>
      %c0_96 = arith.constant 0 : index
      %c0_97 = arith.constant 0 : index
      %c0_98 = arith.constant 0 : index
      %c0_99 = arith.constant 0 : index
      %104 = vector.load %arg5[%c0_96, %c0_97, %c0_98, %c0_99] : memref<1x1x16x16xf32, #tpu.memory_space<vmem>>, vector<1x1x16x16xf32>
      %105 = vector.shape_cast %104 : vector<1x1x16x16xf32> to vector<16x16xf32>
      %106 = vector.shape_cast %103 : vector<16x16xf32> to vector<1x1x16x16xf32>
      tpu.vector_store %arg5[%c0_96, %c0_97, %c0_98, %c0_99], %106 {strides = array<i32>} : memref<1x1x16x16xf32, #tpu.memory_space<vmem>>, vector<1x1x16x16xf32>,
    } else {
    }
    return
  }
  func.func @transform_0(%arg0: i32, %arg1: i32) -> (i32, i32, i32, i32) {
    %c0_i32 = arith.constant 0 : i32
    %c0_i32_0 = arith.constant 0 : i32
    %c0_i32_1 = arith.constant 0 : i32
    return %arg0, %arg1, %c0_i32, %c0_i32_0 : i32, i32, i32, i32
  }
  func.func @transform_1(%arg0: i32, %arg1: i32) -> (i32, i32, i32) {
    %c0_i32 = arith.constant 0 : i32
    %c0_i32_0 = arith.constant 0 : i32
    %c0_i32_1 = arith.constant 0 : i32
    %c0_i32_2 = arith.constant 0 : i32
    return %c0_i32, %c0_i32_0, %c0_i32_1 : i32, i32, i32
  }
  func.func @transform_2(%arg0: i32, %arg1: i32) -> i32 {
    %c0_i32 = arith.constant 0 : i32
    %c0_i32_0 = arith.constant 0 : i32
    return %c0_i32 : i32
  }
  func.func @transform_3(%arg0: i32, %arg1: i32) -> (i32, i32, i32, i32) {
    %c0_i32 = arith.constant 0 : i32
    %c0_i32_0 = arith.constant 0 : i32
    %c0_i32_1 = arith.constant 0 : i32
    %c0_i32_2 = arith.constant 0 : i32
    return %arg0, %c0_i32, %c0_i32_0, %c0_i32_1 : i32, i32, i32, i32
  }
}

</mosaic_0001>

<bundles_post_ra>
// kernel: tpu_custom_call.1
= control target key start
LH: loop header
LB: loop body
LE: loop exit
PB: predicated region body
PF: predicated region fallthrough
CT: control target
= control target key end

     0   :  { %s10359_s0 = inlined_call_operand.hbm [shape: f32[2,4,16,16], index: 0, kind: input, shape index: {}]   ;;  %s10360_s1 = inlined_call_operand.hbm [shape: f32[14,16,16], index: 1, kind: input, shape index: {}]   ;;  %s10361_s2 = inlined_call_operand.<no memory space> [shape: f32[1], index: 2, kind: input, shape index: {}]   ;;  %s10362_s3 = inlined_call_operand.hbm [shape: f32[2,1,16,16], index: 3, kind: output, shape index: {}]  }
   0x1   :  { %8 = sst [smem:[#allocation3]] %s10361_s2 }
   0x2   :  { %9 = vsyncpa [#allocation5], 0 }
   0x3   :  { %11 = vsyncpa [#allocation5 + $0x1], 0 }
   0x4   :  { %12 = vsyncpa [#allocation8], 0 }
   0x5   :  { %13 = vsyncpa [#allocation6], 0 }
   0x6   :  { %15 = vsyncpa [#allocation6 + $0x1], 0  ;;  %s9340_s14 = smov 0   ;;  %s9342_s15 = smov 0  }
   0x7   :  { %s9344_s16 = smov 0   ;;  %s9346_s17 = smov 0  }
   0x8   :  { %s9348_s18 = smov 0   ;;  %s9350_s19 = smov 0  }
   0x9 LB: > { %s7628_s2 = sadd.s32 4294967295, %s9307_s19   ;;  %s7629_s20 = sadd.s32 4294967294, %s9307_s19   ;;  %s9307_s19 = sphi %s9350_s19, %s21_s19   ;;  %s9303_s18 = sphi %s9348_s18, %s10386_s18   ;;  %s9299_s17 = sphi %s9346_s17, %s10385_s17   ;;  %s9295_s16 = sphi %s9344_s16, %s10384_s16   ;;  %s9291_s15 = sphi %s9342_s15, %s10383_s15   ;;  %s9287_s14 = sphi %s9340_s14, %s10382_s14  }
   0xa   : > { %p55_p0 = scmp.ne.s32.totalorder %s9291_s15, %s9287_s14  ;;  %p9374_p1 = scmp.eq.s32.totalorder %s7628_s2, 0 }
   0xb   : > { %p9378_p2 = scmp.eq.s32.totalorder %s7628_s2, 1  ;;  %p127_p3 = scmp.eq.s32.totalorder %s7629_s20, 1 }
   0xc   : > { %s10367_s21 = scalar_select %p9374_p1, 1, 0 }
   0xd   : > { %s10368_s22 = scalar_select %p9378_p2, 1, 0 }
   0xe   : > { %p9384_p4 = por %p9374_p1, %p55_p0  ;;  %p7630_p5 = scmp.ge.s32.totalorder %s9307_s19, 1 }
   0xf   : > { %p9389_p6 = por %p127_p3, %p55_p0  ;;  %p134_p7 = scmp.lt.s32.totalorder %s9307_s19, 3 }
  0x10   : > { %s10369_s23 = scalar_select %p9384_p4, 1, 0 }
  0x11   : > { %s10370_s24 = scalar_select %p9389_p6, 1, 0 }
  0x12   : > { %p9394_p8 = pnand %p7630_p5, %p134_p7  ;;  %s9309_s26 = smov [#allocation7]  }
  0x13   : > { %s146_s27 = sshll.u32 %s9309_s26, 4  ;;  %s33_s29 = sadd.s32 1, %s9303_s18  ;;  %s147_s27 = int_to_ptr.vmem [resolvable:$true] %s146_s27 }
  0x14   : > { %s10371_s25 = scalar_select %p9394_p8, 1, 0 }
  0x15   : > { %p9085_p9 = pneg %p9394_p8  ;;  %s9163_s5 = scalar_lea.hbm %s10360_s1, 3584 }
  0x16   : > { %p9164_p12 = scmp.ne.s32.totalorder %s10360_s1, %s9163_s5  ;;  %p9170_p5 = scmp.lt.u32.totalorder %s9163_s5, %s10360_s1 }
  0x17   : > { %p9403_p11 = pnand %p9085_p9, %p9374_p1 }
  0x19   : > { %p9165_p13 = pneg %p9403_p11 }
  0x1b   : > { %p9166_p0 = pnand %p9165_p13, %p9164_p12 }
  0x1d   : > { %p9167_p3 = pneg %p9166_p0 }
  0x1f   : > { %p9172_p7 = pnand %p9170_p5, %p9167_p3 }
  0x21   : > { %9175 = shalt.err (!%p9172_p7)
}
  0x22   : > { %s9176_s10 = scalar_lea.vmem %s147_s27, 3584  ;;  %p9184_p1 = scmp.lt.s32.totalorder %s147_s27, %s147_s27 }
  0x23   : > { %p9177_p9 = scmp.ne.s32.totalorder %s147_s27, %s9176_s10  ;;  %p9185_p4 = scmp.lt.s32.totalorder %s9176_s10, %s9176_s10 }
  0x25   : > { %p9179_p10 = pnand %p9177_p9, %p9165_p13  ;;  %p9186_p8 = por %p9185_p4, %p9184_p1 }
  0x27   : > { %p9180_p6 = pneg %p9179_p10 }
  0x29   : > { %p9187_p2 = pnand %p9186_p8, %p9180_p6 }
  0x2b   : > { %9190 = shalt.err (!%p9187_p2)
}
  0x2c   : > { %s9310_s11 = smov 128   ;;  %s9311_s12 = smov 8  }
  0x2d   : > { %9088 = dma.hbm_to_vmem [thread:$0]  (!%p9403_p11), %s10360_s1, 3584, %s147_s27, [#allocation8], %s9310_s11, %s9310_s11, %s9311_s12  }
  0x2e   : > { %p35_p1 = scmp.ge.s32.totalorder %s33_s29, 2  ;;  %s42_s20 = sadd.s32 1, %s9295_s16 }
  0x2f   : > { %p49_p2 = scmp.ne.s32.totalorder %s9295_s16, %s9291_s15  ;;  %p50_p4 = scmp.eq.s32.totalorder %s9307_s19, 0 }
  0x30   : > { %s10388_s29 = smov (%p35_p1, %s33_s29), 0  ;;  %p10374_p8 = scmp.ne.s32.totalorder %s10368_s22, 0 }
  0x31   : > { %p9433_p6 = por %p50_p4, %p49_p2  ;;  %s37_s30 = ssub.s32 %s9303_s18, %s10388_s29 }
  0x32   : > { %p9439_p10 = por %p10374_p8, %p49_p2  ;;  %p9098_p12 = scmp.lt.s32.totalorder %s9307_s19, 2 }
  0x33   : > { %p40_p11 = scmp.eq.s32.totalorder %s37_s30, 0  ;;  %s163_s27 = sand.u32 1, %s9295_s16  }
  0x34   : > { %s7633_s4 = sshll.u32 %s163_s27, 6  ;;  %s7647_s6 = sshll.u32 %s9303_s18, 10 }
  0x35   : > { %s9448_s5 = scalar_select %p40_p11, %s9295_s16, %s42_s20  }
  0x36   : > { %s9454_s9 = scalar_lea.hbm %s10359_s0, %s7647_s6  ;;  %s167_s22 = scalar_lea.vmem [#allocation4], %s7633_s4 }
  0x37   : > { %s177_s10 = sshll.u32 %s167_s22, 4  ;;  %p9460_p13 = pnand %p9098_p12, %p9433_p6  ;;  %s9456_s10 = int_to_ptr.vmem [resolvable:$true] %s177_s10 }
  0x38   : > { %s9464_s2 = scalar_lea.sflag [#allocation5], %s163_s27  ;;  %s9191_s20 = scalar_lea.hbm %s9454_s9, 1024 }
  0x39   : > { %p9192_p0 = scmp.ne.s32.totalorder %s9454_s9, %s9191_s20  ;;  %p9193_p3 = pneg %p9460_p13 }
  0x3a   : > { %s9196_s26 = scalar_lea.hbm %s10359_s0, 2048  ;;  %p9197_p9 = scmp.lt.u32.totalorder %s9454_s9, %s10359_s0 }
  0x3b   : > { %p9194_p5 = pnand %p9193_p3, %p9192_p0  ;;  %p9198_p1 = scmp.lt.u32.totalorder %s9196_s26, %s9191_s20 }
  0x3c   : > { %p9200_p4 = scmp.lt.u32.totalorder %s9191_s20, %s9454_s9 }
  0x3d   : > { %p9195_p7 = pneg %p9194_p5  ;;  %p9199_p2 = por %p9198_p1, %p9197_p9 }
  0x3f   : > { %p9201_p6 = por %p9200_p4, %p9199_p2 }
  0x41   : > { %p9202_p8 = pnand %p9201_p6, %p9195_p7 }
  0x43   : > { %9205 = shalt.err (!%p9202_p8)
}
  0x44   : > { %s9206_s27 = scalar_lea.vmem %s9456_s10, 1024  ;;  %s9312_s8 = smov [#allocation4]  }
  0x45   : > { %p9207_p12 = scmp.ne.s32.totalorder %s9456_s10, %s9206_s27  ;;  %s9211_s22 = sshll.u32 %s9312_s8, 4  ;;  %s9212_s22 = int_to_ptr.vmem [resolvable:$false] %s9211_s22 }
  0x46   : > { %s9213_s30 = scalar_lea.vmem %s9212_s22, 2048  ;;  %p9214_p5 = scmp.lt.s32.totalorder %s9456_s10, %s9212_s22 }
  0x47   : > { %p9209_p11 = pnand %p9207_p12, %p9193_p3  ;;  %p9215_p9 = scmp.lt.s32.totalorder %s9213_s30, %s9206_s27 }
  0x49   : > { %p9210_p0 = pneg %p9209_p11  ;;  %p9216_p1 = por %p9215_p9, %p9214_p5 }
  0x4b   : > { %p9217_p2 = pnand %p9216_p1, %p9210_p0 }
  0x4d   : > { %9220 = shalt.err (!%p9217_p2)
}
  0x4e   : > { %9092 = dma.hbm_to_vmem [thread:$0]  (!%p9460_p13), %s9454_s9, 1024, %s9456_s10, %s9464_s2, %s9310_s11, %s9310_s11, %s9311_s12  }
  0x4f   : > { %p10377_p3 = scmp.ne.s32.totalorder %s10371_s25, 0 }
  0x50   : > { %s9498_s20 = sand.u32 (!%p10377_p3), 1, %s9291_s15   ;;  %p10378_p7 = scmp.ne.s32.totalorder (!%p10377_p3), %s10369_s23, 0 }
  0x51   : > { %189 = sbr.rel (%p10377_p3) target bundleno = 714 (0x2ca), region = 32  ;;  %s7637_s4 = sshll.u32 (!%p10377_p3), %s9498_s20, 6 }
  0x52   : > { %s192_s26 = scalar_lea.sflag (!%p10377_p3), [#allocation5], %s9498_s20  ;;  %s9502_s6 = scalar_lea.vmem (!%p10377_p3), [#allocation4], %s7637_s4 }
  0x58   : > { %9274 = dma.done.wait (%p10378_p7), %s192_s26, 1024  }
  0x59   : > { %9276 = vsyncadd (%p10378_p7), %s192_s26, 4294966272  ;;  %p10379_p13 = scmp.ne.s32.totalorder %s10367_s21, 0 }
  0x5b   : > { %9278 = dma.done.wait (%p10379_p13), [#allocation8], 3584  }
  0x5c   : > { %9280 = vsyncadd (%p10379_p13), [#allocation8], 4294963712  ;;  %vm264_vm0 = vcmask 124928   ;;  %v9313_v0 = vmov 0.0   ;;  %vm231_vm1 = vcmask 130048   ;;  %v3904_v1 = vld [vmem:[#allocation7 + $0x70] sm:$0xff] }
  0x5d   : > { %267 = vst.msk [vmem:[#allocation2 + $0x18] sm:$0x7] %vm264_vm0, %v9313_v0  ;;  %265 = vst.msk [vmem:[#allocation2] sm:$0x7] %vm264_vm0, %v9313_v0  ;;  %v3905_v2 = vld [vmem:[#allocation7 + $0x78] sm:$0xff]  ;;  %v298_v3 = vld [vmem:[#allocation7] sm:$0xff] }
  0x5e   : > { %268 = vst.msk [vmem:[#allocation2 + $0x13] sm:$0x7] %vm264_vm0, %v9313_v0  ;;  %269 = vst.msk [vmem:[#allocation2 + $0x2b] sm:$0x7] %vm264_vm0, %v9313_v0  ;;  %v3913_v4 = vand.u32 4294901760, %v3904_v1  ;;  %v3916_v5 = vand.u32 4294901760, %v3905_v2 }
  0x5f   : > { %v299_v6 = vld [vmem:[#allocation7 + $0x8] sm:$0xff]  ;;  %v307_v7 = vand.u32 4294901760, %v298_v3  ;;  %v223_v8 = vld [vmem:[%s9502_s6] sm:$0xff]  ;;  %v225_v9 = vld [vmem:[%s9502_s6 + $0x10] sm:$0xff]  ;;  %s294_s21 = sld [smem:[#allocation3]]  ;;  %s7639_s23 = sshll.u32 %s9498_s20, 4 }
  0x60   : > { %v310_v10 = vand.u32 4294901760, %v299_v6  ;;  %v227_v11 = vld [vmem:[%s9502_s6 + $0x20] sm:$0xff]  ;;  %v229_v12 = vld [vmem:[%s9502_s6 + $0x30] sm:$0xff]  ;;  %v246_v13 = vsel %vm231_vm1, %v223_v8, -inf  ;;  %v247_v14 = vsel %vm231_vm1, %v225_v9, -inf  ;;  %v224_v15 = vld [vmem:[%s9502_s6 + $0x8] sm:$0xff]  ;;  %v9519_v16 = vpack.c.bf16 %v3916_v5, %v3913_v4 }
  0x61   : > { %v248_v17 = vsel %vm231_vm1, %v227_v11, -inf  ;;  %v250_v18 = vsel %vm231_vm1, %v229_v12, -inf  ;;  %v226_v19 = vld [vmem:[%s9502_s6 + $0x18] sm:$0xff]  ;;  %v228_v20 = vld [vmem:[%s9502_s6 + $0x28] sm:$0xff]  ;;  %v253_v22 = vsel %vm231_vm1, %v224_v15, -inf  ;;  %v232_v29 = vsel %vm231_vm1, %v223_v8, 0.0 }
  0x62   : > { %v230_v21 = vld [vmem:[%s9502_s6 + $0x38] sm:$0xff]  ;;  %v9527_v23 = vpack.c.bf16 %v310_v10, %v307_v7  ;;  %v249_v24 = vmax.f32 %v246_v13, %v248_v17  ;;  %v251_v25 = vmax.f32 %v247_v14, %v250_v18  ;;  %v254_v26 = vsel %vm231_vm1, %v226_v19, -inf  ;;  %8742 = vmatprep.subr.bf16.mxu0 %v9519_v16  ;;  %s7648_s25 = sshll.u32 %s9299_s17, 8  ;;  %s221_s11 = scalar_lea.vmem [#allocation9], %s7639_s23 }
  0x63   : > { %v255_v27 = vsel %vm231_vm1, %v228_v20, -inf  ;;  %v257_v28 = vsel %vm231_vm1, %v230_v21, -inf  ;;  %v233_v30 = vsel %vm231_vm1, %v225_v9, 0.0  ;;  %8744 = vmatpush3.bf16.msra.mxu0 %v9519_v16  ;;  %v235_v34 = vsel %vm231_vm1, %v227_v11, 0.0  ;;  %s7534_s12 = sshll.u32 %s221_s11, 4  ;;  %s10306_s13 = scalar_lea.hbm %s10362_s3, %s7648_s25  ;;  %s10308_s12 = int_to_ptr.vmem [resolvable:$true] %s7534_s12 }
  0x64   : > { %8574 = vmatprep.subr.bf16.mxu1 %v9527_v23  ;;  %v252_v31 = vmax.f32 %v249_v24, %v251_v25  ;;  %v256_v32 = vmax.f32 %v253_v22, %v255_v27  ;;  %v258_v33 = vmax.f32 %v254_v26, %v257_v28  ;;  %v234_v35 = vadd.f32 %v233_v30, %v232_v29  ;;  %s7521_s2 = scalar_lea.sflag [#allocation6], %s9498_s20  ;;  %s9221_s17 = scalar_lea.vmem %s10308_s12, 256 }
  0x65   : > { %8576 = vmatpush3.bf16.msra.mxu1 %v9527_v23  ;;  %v237_v36 = vsel %vm231_vm1, %v229_v12, 0.0  ;;  %v9540_v37 = vsub.f32 %v298_v3, %v307_v7  ;;  %v9542_v38 = vsub.f32 %v299_v6, %v310_v10  ;;  %v239_v40 = vsel %vm231_vm1, %v224_v15, 0.0  ;;  %p9222_p4 = scmp.ne.s32.totalorder %s10308_s12, %s9221_s17  ;;  %s9314_s7 = smov [#allocation9]  }
  0x66   : > { %272 = vst.msk [vmem:[#allocation2 + $0x1b] sm:$0xff] %vm231_vm1, %v252_v31  ;;  %v259_v39 = vmax.f32 %v256_v32, %v258_v33  ;;  %v240_v41 = vsel %vm231_vm1, %v226_v19, 0.0  ;;  %v242_v42 = vsel %vm231_vm1, %v228_v20, 0.0  ;;  %v236_v43 = vadd.f32 %v235_v34, %v234_v35  ;;  %v4419_v34 = vld [vmem:[#allocation7 + $0x80] sm:$0xff]  ;;  %v4420_v35 = vld [vmem:[#allocation7 + $0x88] sm:$0xff]  ;;  %s9225_s27 = sshll.u32 %s9314_s7, 4  ;;  %s9226_s27 = int_to_ptr.vmem [resolvable:$false] %s9225_s27 }
  0x67   : > { %v396_v44 = vand.u32 4294901760, %v9540_v37  ;;  %v403_v45 = vand.u32 4294901760, %v9542_v38  ;;  %v241_v46 = vadd.f32 %v240_v41, %v239_v40  ;;  %v244_v47 = vsel %vm231_vm1, %v230_v21, 0.0  ;;  %p9223_p6 = pnand %p9222_p4, %p9439_p10  ;;  %s9227_s8 = scalar_lea.vmem %s9226_s27, 512 }
  0x68   : > { %273 = vst.msk [vmem:[#allocation2 + $0x23] sm:$0xff] %vm231_vm1, %v259_v39  ;;  %v9552_v48 = vsub.f32 %v3904_v1, %v3913_v4  ;;  %v9554_v49 = vsub.f32 %v3905_v2, %v3916_v5  ;;  %v238_v50 = vadd.f32 %v237_v36, %v236_v43  ;;  %v8581_v32 = vpack.c.bf16 %v9542_v38, %v9540_v37  ;;  %v813_v43 = vld [vmem:[#allocation7 + $0x10] sm:$0xff]  ;;  %p9228_p12 = scmp.lt.s32.totalorder %s10308_s12, %s9226_s27  ;;  %p9229_p11 = scmp.lt.s32.totalorder %s9227_s8, %s9221_s17 }
  0x69   : > { %v397_v51 = vsub.f32 %v9540_v37, %v396_v44  ;;  %v404_v52 = vsub.f32 %v9542_v38, %v403_v45  ;;  %v243_v53 = vadd.f32 %v242_v42, %v241_v46  ;;  %v4428_v39 = vand.u32 4294901760, %v4419_v34  ;;  %v814_v46 = vld [vmem:[#allocation7 + $0x18] sm:$0xff]  ;;  %p9224_p8 = pneg %p9223_p6 }
  0x6a   : > { %v4002_v54 = vand.u32 4294901760, %v9552_v48  ;;  %v4009_v55 = vand.u32 4294901760, %v9554_v49  ;;  %270 = vst.msk [vmem:[#allocation2 + $0x3] sm:$0xff] %vm231_vm1, %v238_v50  ;;  %v8749_v26 = vpack.c.bf16 %v9554_v49, %v9552_v48  ;;  %v4431_v40 = vand.u32 4294901760, %v4420_v35  ;;  %p9230_p0 = por %p9229_p11, %p9228_p12 }
  0x6b   : > { %v398_v56 = vand.u32 4294901760, %v397_v51  ;;  %v405_v57 = vand.u32 4294901760, %v404_v52  ;;  %v245_v58 = vadd.f32 %v244_v47, %v243_v53  ;;  %v8589_v42 = vpack.c.bf16 %v403_v45, %v396_v44 }
  0x6c   : > { %v4003_v59 = vsub.f32 %v9552_v48, %v4002_v54  ;;  %v4010_v60 = vsub.f32 %v9554_v49, %v4009_v55  ;;  %v8757_v33 = vpack.c.bf16 %v4009_v55, %v4002_v54  ;;  %v9613_v50 = vsub.f32 %v4419_v34, %v4428_v39  ;;  %p9231_p5 = pnand %p9230_p0, %p9224_p8 }
  0x6d   : > { %v3901_v61 = vld [vmem:[#allocation2 + $0x18] sm:$0xff]  ;;  %v8577_v62 = vpack.c.bf16 %v405_v57, %v398_v56  ;;  %271 = vst.msk [vmem:[#allocation2 + $0xb] sm:$0xff] %vm231_vm1, %v245_v58  ;;  %v9615_v51 = vsub.f32 %v4420_v35, %v4431_v40  ;;  %v822_v37 = vand.u32 4294901760, %v813_v43  ;;  %v825_v52 = vand.u32 4294901760, %v814_v46 }
  0x6e   : > { %v3907_v63 = vsel %vm231_vm1, %v3901_v61, 0  ;;  %v4004_v0 = vand.u32 4294901760, %v4003_v59  ;;  %v4011_v1 = vand.u32 4294901760, %v4010_v60  ;;  %v4416_v36 = vld [vmem:[#allocation2 + $0x19] sm:$0xff]  ;;  %v4517_v54 = vand.u32 4294901760, %v9613_v50 }
  0x6f   : > { %v9569_v2 = vand.u32 4294901760, %v3907_v63  ;;  %v3902_v3 = vld [vmem:[#allocation2 + $0x20] sm:$0xff]  ;;  %8578 = vmatprep.subr.bf16.mxu1 %v8577_v62  ;;  %v4422_v41 = vsel %vm231_vm1, %v4416_v36, 0  ;;  %v4524_v55 = vand.u32 4294901760, %v9615_v51  ;;  %v9628_v56 = vsub.f32 %v813_v43, %v822_v37 }
  0x70   : > { %v3910_v4 = vsel %vm231_vm1, %v3902_v3, 0  ;;  %v8745_v5 = vpack.c.bf16 %v4011_v1, %v4004_v0  ;;  %v9610_v48 = vand.u32 4294901760, %v4422_v41  ;;  %v4417_v49 = vld [vmem:[#allocation2 + $0x21] sm:$0xff]  ;;  %v9630_v57 = vsub.f32 %v814_v46, %v825_v52 }
  0x71   : > { %v3980_v6 = vsub.f32 %v3907_v63, %v9569_v2  ;;  %v9573_v7 = vand.u32 4294901760, %v3910_v4  ;;  %v296_v8 = vld [vmem:[#allocation2] sm:$0xff]  ;;  %v4425_v45 = vsel %vm231_vm1, %v4417_v49, 0  ;;  %v9634_v60 = vpack.c.bf16 %v4431_v40, %v4428_v39  ;;  %v1328_v39 = vld [vmem:[#allocation7 + $0x20] sm:$0xff]  ;;  %v1329_v40 = vld [vmem:[#allocation7 + $0x28] sm:$0xff] }
  0x72   : > { %8746 = vmatprep.subr.bf16.mxu0 %v8745_v5  ;;  %v301_v11 = vsel %vm231_vm1, %v296_v8, 0  ;;  %v810_v47 = vld [vmem:[#allocation2 + $0x1] sm:$0xff]  ;;  %v9620_v44 = vsub.f32 %v4422_v41, %v9610_v48  ;;  %v9632_v59 = vand.u32 4294901760, %v4425_v45  ;;  %v4518_v0 = vsub.f32 %v9613_v50, %v4517_v54 }
  0x73   : > { %v3981_v9 = vand.u32 4294901760, %v3980_v6  ;;  %v9576_v10 = vsub.f32 %v3910_v4, %v9573_v7  ;;  %v9579_v12 = vand.u32 4294901760, %v301_v11  ;;  %v816_v38 = vsel %vm231_vm1, %v810_v47, 0  ;;  %v1325_v41 = vld [vmem:[#allocation2 + $0x2] sm:$0xff] }
  0x74   : > { %v297_v13 = vld [vmem:[#allocation2 + $0x8] sm:$0xff]  ;;  %v9624_v53 = vand.u32 4294901760, %v816_v38  ;;  %v4496_v61 = vand.u32 4294901760, %v9620_v44  ;;  %v4525_v1 = vsub.f32 %v9615_v51, %v4524_v55  ;;  %v911_v3 = vand.u32 4294901760, %v9628_v56 }
  0x75   : > { %v3982_v14 = vsub.f32 %v3980_v6, %v3981_v9  ;;  %v3991_v15 = vand.u32 4294901760, %v9576_v10  ;;  %v304_v17 = vsel %vm231_vm1, %v297_v13, 0  ;;  %v374_v18 = vsub.f32 %v301_v11, %v9579_v12  ;;  %v811_v58 = vld [vmem:[#allocation2 + $0x9] sm:$0xff] }
  0x76   : > { %v9584_v19 = vand.u32 4294901760, %v304_v17  ;;  %v819_v63 = vsel %vm231_vm1, %v811_v58, 0  ;;  %v918_v4 = vand.u32 4294901760, %v9630_v57  ;;  %v4526_v11 = vand.u32 4294901760, %v4525_v1  ;;  %v4932_v43 = vld [vmem:[#allocation2 + $0x22] sm:$0xff] }
  0x77   : > { %v3983_v20 = vand.u32 4294901760, %v3982_v14  ;;  %v3992_v21 = vsub.f32 %v9576_v10, %v3991_v15  ;;  %v375_v22 = vand.u32 4294901760, %v374_v18  ;;  %v9660_v8 = vand.u32 4294901760, %v819_v63 }
  0x78   : > { %v9588_v24 = vsub.f32 %v304_v17, %v9584_v19  ;;  %v9664_v13 = vpack.c.bf16 %v825_v52, %v822_v37  ;;  %v8613_v36 = vpack.c.bf16 %v918_v4, %v911_v3  ;;  %v1337_v49 = vand.u32 4294901760, %v1328_v39 }
  0x79   : > { %8283 = vmatprep.mubr.f32.mxu0 %v3983_v20  ;;  %v3993_v25 = vand.u32 4294901760, %v3992_v21  ;;  %v376_v27 = vsub.f32 %v374_v18, %v375_v22  ;;  %v9675_v17 = vsub.f32 %v819_v63, %v9660_v8  ;;  %v4940_v52 = vsel %vm231_vm1, %v4932_v43, 0 }
  0x7a   : > { %v385_v28 = vand.u32 4294901760, %v9588_v24 }
  0x7b   : > { %8284 = vmatmul.mubr.f32.vlgmr.msra.gmra.mrb[0].mxu0 %v3993_v25  ;;  %v377_v29 = vand.u32 4294901760, %v376_v27 }
  0x7c   : > { %v386_v30 = vsub.f32 %v9588_v24, %v385_v28  ;;  %8748 = vmatpush3.bf16.msra.mxu0 %v8745_v5  ;;  %8290 = vmatprep.mubr.f32.mxu0 %v9569_v2  ;;  %v9653_v5 = vsub.f32 %v4425_v45, %v9632_v59 }
  0x7d   : > { %8750 = vmatprep.subr.bf16.mxu0 %v8749_v26  ;;  %7989 = vmatprep.mubr.f32.mxu1 %v377_v29  ;;  %v8781_v29 = vpack.c.bf16 %v4524_v55, %v4517_v54  ;;  %v9742_v54 = vsub.f32 %v1328_v39, %v1337_v49  ;;  %v5447_v39 = vld [vmem:[#allocation2 + $0x23] sm:$0xff] }
  0x7e   : > { %v387_v31 = vand.u32 4294901760, %v386_v30  ;;  %v4506_v14 = vand.u32 4294901760, %v9653_v5  ;;  %v4934_v30 = vld [vmem:[#allocation7 + $0x90] sm:$0xff] }
  0x80   : > { %7990 = vmatmul.mubr.f32.vlgmr.msra.gmra.mrb[0].mxu1 %v387_v31  ;;  %v4935_v31 = vld [vmem:[#allocation7 + $0x98] sm:$0xff] }
  0x81   : > { %8580 = vmatpush3.bf16.msra.mxu1 %v8577_v62  ;;  %7996 = vmatprep.mubr.f32.mxu1 %v9579_v12  ;;  %v9639_v62 = vsub.f32 %v816_v38, %v9624_v53  ;;  %v4946_v34 = vand.u32 4294901760, %v4935_v31 }
  0x82   : > { %8582 = vmatprep.subr.bf16.mxu1 %v8581_v32 }
  0x83   : > { %8291 = vmatmul.mubr.f32.vlgmr.msra.gmra.mrb[0].mxu0 %v9573_v7  ;;  %v9727_v47 = vsub.f32 %v4935_v31, %v4946_v34 }
  0x84   : > { %8752 = vmatpush3.bf16.msra.mxu0 %v8749_v26  ;;  %8297 = vmatprep.mubr.f32.mxu0 %v3980_v6  ;;  %v4497_v6 = vsub.f32 %v9620_v44, %v4496_v61 }
  0x85   : > { %8754 = vmatprep.subr.bf16.mxu0 %v9519_v16  ;;  %v5039_v45 = vand.u32 4294901760, %v9727_v47 }
  0x87   : > { %v5040_v1 = vsub.f32 %v9727_v47, %v5039_v45 }
  0x88   : > { %7997 = vmatmul.mubr.f32.vlgmr.msra.gmra.mrb[0].mxu1 %v9584_v19 }
  0x89   : > { %8584 = vmatpush3.bf16.msra.mxu1 %v8581_v32  ;;  %8003 = vmatprep.mubr.f32.mxu1 %v374_v18  ;;  %v4931_v32 = vld [vmem:[#allocation2 + $0x1a] sm:$0xff] }
  0x8a   : > { %8586 = vmatprep.subr.bf16.mxu1 %v9527_v23  ;;  %v4937_v35 = vsel %vm231_vm1, %v4931_v32, 0 }
  0x8b   : > { %8298 = vmatmul.mubr.f32.vlgmr.msra.gmra.mrb[0].mxu0 %v9576_v10  ;;  %v4519_v10 = vand.u32 4294901760, %v4518_v0 }
  0x8c   : > { %8756 = vmatpush3.bf16.msra.mxu0 %v9519_v16  ;;  %8304 = vmatprep.mubr.f32.mxu0 %v3981_v9  ;;  %v890_v9 = vand.u32 4294901760, %v9639_v62 }
  0x8d   : > { %8758 = vmatprep.subr.bf16.mxu0 %v8757_v33  ;;  %v8769_v20 = vpack.c.bf16 %v4526_v11, %v4519_v10 }
  0x8e   : > { %v891_v18 = vsub.f32 %v9639_v62, %v890_v9 }
  0x90   : > { %8004 = vmatmul.mubr.f32.vlgmr.msra.gmra.mrb[0].mxu1 %v9588_v24  ;;  %v4507_v24 = vsub.f32 %v9653_v5, %v4506_v14 }
  0x91   : > { %8588 = vmatpush3.bf16.msra.mxu1 %v9527_v23  ;;  %8010 = vmatprep.mubr.f32.mxu1 %v375_v22 }
  0x92   : > { %8590 = vmatprep.subr.bf16.mxu1 %v8589_v42  ;;  %v4508_v26 = vand.u32 4294901760, %v4507_v24 }
  0x93   : > { %8305 = vmatmul.mubr.f32.vlgmr.msra.gmra.mrb[0].mxu0 %v3991_v15  ;;  %v4498_v15 = vand.u32 4294901760, %v4497_v6 }
  0x94   : > { %8760 = vmatpush3.bf16.msra.mxu0 %v8757_v33  ;;  %8311 = vmatprep.mubr.f32.mxu0 %v9569_v2  ;;  %v4943_v33 = vand.u32 4294901760, %v4934_v30 }
  0x95   : > { %8762 = vmatprep.subr.bf16.mxu0 %v9519_v16 }
  0x96   : > { %v9725_v46 = vsub.f32 %v4934_v30, %v4943_v33  ;;  %v9750_v58 = vpack.c.bf16 %v4946_v34, %v4943_v33  ;;  %v1843_v33 = vld [vmem:[#allocation7 + $0x30] sm:$0xff]  ;;  %v1844_v34 = vld [vmem:[#allocation7 + $0x38] sm:$0xff] }
  0x97   : > { %v1852_v43 = vand.u32 4294901760, %v1843_v33 }
  0x98   : > { %8011 = vmatmul.mubr.f32.vlgmr.msra.gmra.mrb[0].mxu1 %v385_v28 }
  0x99   : > { %8592 = vmatpush3.bf16.msra.mxu1 %v8589_v42  ;;  %8017 = vmatprep.mubr.f32.mxu1 %v9579_v12  ;;  %v9720_v42 = vand.u32 4294901760, %v4937_v35 }
  0x9a   : > { %8594 = vmatprep.subr.bf16.mxu1 %v9527_v23 }
  0x9b   : > { %8312 = vmatmul.mubr.f32.vlgmr.msra.gmra.mrb[0].mxu0 %v9573_v7  ;;  %v9734_v37 = vsub.f32 %v4937_v35, %v9720_v42  ;;  %v1840_v35 = vld [vmem:[#allocation2 + $0x3] sm:$0xff] }
  0x9c   : > { %8764 = vmatpush3.bf16.msra.mxu0 %v9519_v16  ;;  %8318 = vmatprep.mubr.f32.mxu0 %v9569_v2  ;;  %v912_v16 = vsub.f32 %v9628_v56, %v911_v3  ;;  %v919_v2 = vsub.f32 %v9630_v57, %v918_v4  ;;  %v1426_v3 = vand.u32 4294901760, %v9742_v54 }
  0x9d   : > { %8766 = vmatprep.subr.bf16.mxu0 %v9634_v60 }
  0x9e   : > { %v913_v21 = vand.u32 4294901760, %v912_v16  ;;  %v920_v22 = vand.u32 4294901760, %v919_v2  ;;  %v5041_v16 = vand.u32 4294901760, %v5040_v1 }
  0xa0   : > { %8018 = vmatmul.mubr.f32.vlgmr.msra.gmra.mrb[0].mxu1 %v9584_v19  ;;  %v8601_v25 = vpack.c.bf16 %v920_v22, %v913_v21 }
  0xa1   : > { %8596 = vmatpush3.bf16.msra.mxu1 %v9527_v23  ;;  %8024 = vmatprep.mubr.f32.mxu1 %v9579_v12  ;;  %v900_v23 = vand.u32 4294901760, %v9675_v17  ;;  %v892_v12 = vand.u32 4294901760, %v891_v18 }
  0xa2   : > { %8598 = vmatprep.subr.bf16.mxu1 %v9664_v13 }
  0xa3   : > { %8319 = vmatmul.mubr.f32.vlgmr.msra.gmra.mrb[0].mxu0 %v9573_v7  ;;  %v901_v27 = vsub.f32 %v9675_v17, %v900_v23  ;;  %v8773_v7 = vpack.c.bf16 %v9615_v51, %v9613_v50  ;;  %v1340_v50 = vand.u32 4294901760, %v1329_v40  ;;  %v1331_v51 = vsel %vm231_vm1, %v1325_v41, 0 }
  0xa4   : > { %8768 = vmatpush3.bf16.msra.mxu0 %v9634_v60  ;;  %8325 = vmatprep.mubr.f32.mxu0 %v4498_v15  ;;  %v9738_v38 = vand.u32 4294901760, %v1331_v51 }
  0xa5   : > { %8770 = vmatprep.subr.bf16.mxu0 %v8769_v20  ;;  %v902_v28 = vand.u32 4294901760, %v901_v27  ;;  %v9744_v55 = vsub.f32 %v1329_v40, %v1340_v50  ;;  %v9780_v2 = vpack.c.bf16 %v1340_v50, %v1337_v49  ;;  %v5455_v50 = vsel %vm231_vm1, %v5447_v39, 0 }
  0xa7   : > { %v1433_v4 = vand.u32 4294901760, %v9744_v55 }
  0xa8   : > { %8025 = vmatmul.mubr.f32.vlgmr.msra.gmra.mrb[0].mxu1 %v9584_v19  ;;  %v8605_v19 = vpack.c.bf16 %v9630_v57, %v9628_v56  ;;  %v1326_v56 = vld [vmem:[#allocation2 + $0xa] sm:$0xff]  ;;  %v9746_v57 = vand.u32 4294901760, %v4940_v52 }
  0xa9   : > { %8600 = vmatpush3.bf16.msra.mxu1 %v9664_v13  ;;  %8031 = vmatprep.mubr.f32.mxu1 %v892_v12  ;;  %v1334_v63 = vsel %vm231_vm1, %v1326_v56, 0  ;;  %v8637_v32 = vpack.c.bf16 %v1433_v4, %v1426_v3 }
  0xaa   : > { %8602 = vmatprep.subr.bf16.mxu1 %v8601_v25 }
  0xab   : > { %8326 = vmatmul.mubr.f32.vlgmr.msra.gmra.mrb[0].mxu0 %v4508_v26 }
  0xac   : > { %8772 = vmatpush3.bf16.msra.mxu0 %v8769_v20  ;;  %8332 = vmatprep.mubr.f32.mxu0 %v9610_v48 }
  0xad   : > { %8774 = vmatprep.subr.bf16.mxu0 %v8773_v7 }
  0xb0   : > { %8032 = vmatmul.mubr.f32.vlgmr.msra.gmra.mrb[0].mxu1 %v902_v28  ;;  %v5450_v28 = vld [vmem:[#allocation7 + $0xa8] sm:$0xff] }
  0xb1   : > { %8604 = vmatpush3.bf16.msra.mxu1 %v8601_v25  ;;  %8038 = vmatprep.mubr.f32.mxu1 %v9624_v53  ;;  %v5461_v30 = vand.u32 4294901760, %v5450_v28 }
  0xb2   : > { %8606 = vmatprep.subr.bf16.mxu1 %v8605_v19 }
  0xb3   : > { %8333 = vmatmul.mubr.f32.vlgmr.msra.gmra.mrb[0].mxu0 %v9632_v59  ;;  %v9843_v41 = vsub.f32 %v5450_v28, %v5461_v30 }
  0xb4   : > { %8776 = vmatpush3.bf16.msra.mxu0 %v8773_v7  ;;  %8339 = vmatprep.mubr.f32.mxu0 %v9620_v44  ;;  %v5032_v44 = vand.u32 4294901760, %v9725_v46  ;;  %v5449_v7 = vld [vmem:[#allocation7 + $0xa0] sm:$0xff] }
  0xb5   : > { %8778 = vmatprep.subr.bf16.mxu0 %v9634_v60 }
  0xb6   : > { %v5033_v0 = vsub.f32 %v9725_v46, %v5032_v44  ;;  %v8805_v27 = vpack.c.bf16 %v5039_v45, %v5032_v44  ;;  %v9858_v44 = vsub.f32 %v1843_v33, %v1852_v43  ;;  %v5962_v33 = vld [vmem:[#allocation2 + $0x24] sm:$0xff] }
  0xb8   : > { %8039 = vmatmul.mubr.f32.vlgmr.msra.gmra.mrb[0].mxu1 %v9660_v8  ;;  %v5034_v11 = vand.u32 4294901760, %v5033_v0 }
  0xb9   : > { %8608 = vmatpush3.bf16.msra.mxu1 %v8605_v19  ;;  %8045 = vmatprep.mubr.f32.mxu1 %v9639_v62  ;;  %v9755_v62 = vsub.f32 %v1331_v51, %v9738_v38  ;;  %v5446_v19 = vld [vmem:[#allocation2 + $0x1b] sm:$0xff] }
  0xba   : > { %8610 = vmatprep.subr.bf16.mxu1 %v9664_v13  ;;  %v8793_v20 = vpack.c.bf16 %v5041_v16, %v5034_v11  ;;  %v5452_v31 = vsel %vm231_vm1, %v5446_v19, 0 }
  0xbb   : > { %8340 = vmatmul.mubr.f32.vlgmr.msra.gmra.mrb[0].mxu0 %v9653_v5  ;;  %v9769_v5 = vsub.f32 %v4940_v52, %v9746_v57  ;;  %v1405_v10 = vand.u32 4294901760, %v9755_v62  ;;  %v5554_v52 = vand.u32 4294901760, %v9843_v41 }
  0xbc   : > { %8780 = vmatpush3.bf16.msra.mxu0 %v9634_v60  ;;  %8346 = vmatprep.mubr.f32.mxu0 %v4496_v61  ;;  %v5011_v61 = vand.u32 4294901760, %v9734_v37 }
  0xbd   : > { %8782 = vmatprep.subr.bf16.mxu0 %v8781_v29  ;;  %v1406_v18 = vsub.f32 %v9755_v62, %v1405_v10  ;;  %v5555_v1 = vsub.f32 %v9843_v41, %v5554_v52 }
  0xbe   : > { %v5012_v6 = vsub.f32 %v9734_v37, %v5011_v61 }
  0xc0   : > { %8046 = vmatmul.mubr.f32.vlgmr.msra.gmra.mrb[0].mxu1 %v9675_v17  ;;  %v5013_v15 = vand.u32 4294901760, %v5012_v6 }
  0xc1   : > { %8612 = vmatpush3.bf16.msra.mxu1 %v9664_v13  ;;  %8052 = vmatprep.mubr.f32.mxu1 %v890_v9  ;;  %v9776_v9 = vand.u32 4294901760, %v1334_v63 }
  0xc2   : > { %8614 = vmatprep.subr.bf16.mxu1 %v8613_v36 }
  0xc3   : > { %8347 = vmatmul.mubr.f32.vlgmr.msra.gmra.mrb[0].mxu0 %v4506_v14  ;;  %v5021_v14 = vand.u32 4294901760, %v9769_v5  ;;  %v9791_v17 = vsub.f32 %v1334_v63, %v9776_v9 }
  0xc4   : > { %8784 = vmatpush3.bf16.msra.mxu0 %v8781_v29  ;;  %8353 = vmatprep.mubr.f32.mxu0 %v9610_v48  ;;  %v5458_v29 = vand.u32 4294901760, %v5449_v7 }
  0xc5   : > { %8786 = vmatprep.subr.bf16.mxu0 %v9634_v60  ;;  %v5022_v24 = vsub.f32 %v9769_v5, %v5021_v14 }
  0xc6   : > { %v9841_v40 = vsub.f32 %v5449_v7, %v5458_v29  ;;  %v9866_v56 = vpack.c.bf16 %v5461_v30, %v5458_v29  ;;  %v2355_v29 = vld [vmem:[#allocation2 + $0x4] sm:$0xff]  ;;  %v2358_v30 = vld [vmem:[#allocation7 + $0x40] sm:$0xff] }
  0xc7   : > { %v5023_v12 = vand.u32 4294901760, %v5022_v24 }
  0xc8   : > { %8053 = vmatmul.mubr.f32.vlgmr.msra.gmra.mrb[0].mxu1 %v900_v23 }
  0xc9   : > { %8616 = vmatpush3.bf16.msra.mxu1 %v8613_v36  ;;  %8059 = vmatprep.mubr.f32.mxu1 %v9624_v53  ;;  %v9836_v36 = vand.u32 4294901760, %v5452_v31 }
  0xca   : > { %8618 = vmatprep.subr.bf16.mxu1 %v9664_v13 }
  0xcb   : > { %8354 = vmatmul.mubr.f32.vlgmr.msra.gmra.mrb[0].mxu0 %v9632_v59  ;;  %v9850_v49 = vsub.f32 %v5452_v31, %v9836_v36  ;;  %v2359_v31 = vld [vmem:[#allocation7 + $0x48] sm:$0xff] }
  0xcc   : > { %8788 = vmatpush3.bf16.msra.mxu0 %v9634_v60  ;;  %8360 = vmatprep.mubr.f32.mxu0 %v9610_v48  ;;  %v1427_v60 = vsub.f32 %v9742_v54, %v1426_v3  ;;  %v1434_v48 = vsub.f32 %v9744_v55, %v1433_v4  ;;  %v1941_v3 = vand.u32 4294901760, %v9858_v44 }
  0xcd   : > { %8790 = vmatprep.subr.bf16.mxu0 %v9750_v58 }
  0xce   : > { %v1428_v21 = vand.u32 4294901760, %v1427_v60  ;;  %v1435_v22 = vand.u32 4294901760, %v1434_v48  ;;  %v5556_v60 = vand.u32 4294901760, %v5555_v1 }
  0xd0   : > { %8060 = vmatmul.mubr.f32.vlgmr.msra.gmra.mrb[0].mxu1 %v9660_v8  ;;  %v8625_v23 = vpack.c.bf16 %v1435_v22, %v1428_v21 }
  0xd1   : > { %8620 = vmatpush3.bf16.msra.mxu1 %v9664_v13  ;;  %8066 = vmatprep.mubr.f32.mxu1 %v9624_v53  ;;  %v1415_v53 = vand.u32 4294901760, %v9791_v17  ;;  %v1407_v13 = vand.u32 4294901760, %v1406_v18 }
  0xd2   : > { %8622 = vmatprep.subr.bf16.mxu1 %v9780_v2 }
  0xd3   : > { %8361 = vmatmul.mubr.f32.vlgmr.msra.gmra.mrb[0].mxu0 %v9632_v59  ;;  %v1416_v25 = vsub.f32 %v9791_v17, %v1415_v53  ;;  %v8797_v59 = vpack.c.bf16 %v9727_v47, %v9725_v46  ;;  %v1855_v46 = vand.u32 4294901760, %v1844_v34  ;;  %v1846_v47 = vsel %vm231_vm1, %v1840_v35, 0 }
  0xd4   : > { %8792 = vmatpush3.bf16.msra.mxu0 %v9750_v58  ;;  %8367 = vmatprep.mubr.f32.mxu0 %v5013_v15  ;;  %v9854_v51 = vand.u32 4294901760, %v1846_v47 }
  0xd5   : > { %8794 = vmatprep.subr.bf16.mxu0 %v8793_v20  ;;  %v1417_v26 = vand.u32 4294901760, %v1416_v25  ;;  %v9860_v45 = vsub.f32 %v1844_v34, %v1855_v46  ;;  %v9896_v48 = vpack.c.bf16 %v1855_v46, %v1852_v43  ;;  %v2361_v34 = vsel %vm231_vm1, %v2355_v29, 0  ;;  %v6477_v29 = vld [vmem:[#allocation2 + $0x25] sm:$0xff] }
  0xd6   : > { %v5970_v46 = vsel %vm231_vm1, %v5962_v33, 0 }
  0xd7   : > { %v1948_v4 = vand.u32 4294901760, %v9860_v45 }
  0xd8   : > { %8067 = vmatmul.mubr.f32.vlgmr.msra.gmra.mrb[0].mxu1 %v9660_v8  ;;  %v8629_v8 = vpack.c.bf16 %v9744_v55, %v9742_v54  ;;  %v1841_v54 = vld [vmem:[#allocation2 + $0xb] sm:$0xff]  ;;  %v9862_v55 = vand.u32 4294901760, %v5455_v50 }
  0xd9   : > { %8624 = vmatpush3.bf16.msra.mxu1 %v9780_v2  ;;  %8073 = vmatprep.mubr.f32.mxu1 %v1407_v13  ;;  %v1849_v63 = vsel %vm231_vm1, %v1841_v54, 0  ;;  %v8661_v19 = vpack.c.bf16 %v1948_v4, %v1941_v3 }
  0xda   : > { %8626 = vmatprep.subr.bf16.mxu1 %v8625_v23 }
  0xdb   : > { %8368 = vmatmul.mubr.f32.vlgmr.msra.gmra.mrb[0].mxu0 %v5023_v12 }
  0xdc   : > { %8796 = vmatpush3.bf16.msra.mxu0 %v8793_v20  ;;  %8374 = vmatprep.mubr.f32.mxu0 %v9720_v42 }
  0xdd   : > { %8798 = vmatprep.subr.bf16.mxu0 %v8797_v59 }
  0xe0   : > { %8074 = vmatmul.mubr.f32.vlgmr.msra.gmra.mrb[0].mxu1 %v1417_v26  ;;  %v5965_v26 = vld [vmem:[#allocation7 + $0xb8] sm:$0xff] }
  0xe1   : > { %8628 = vmatpush3.bf16.msra.mxu1 %v8625_v23  ;;  %8080 = vmatprep.mubr.f32.mxu1 %v9738_v38  ;;  %v5976_v7 = vand.u32 4294901760, %v5965_v26 }
  0xe2   : > { %8630 = vmatprep.subr.bf16.mxu1 %v8629_v8 }
  0xe3   : > { %8375 = vmatmul.mubr.f32.vlgmr.msra.gmra.mrb[0].mxu0 %v9746_v57  ;;  %v9960_v39 = vsub.f32 %v5965_v26, %v5976_v7 }
  0xe4   : > { %8800 = vmatpush3.bf16.msra.mxu0 %v8797_v59  ;;  %8381 = vmatprep.mubr.f32.mxu0 %v9734_v37  ;;  %v5547_v37 = vand.u32 4294901760, %v9841_v40  ;;  %v5964_v59 = vld [vmem:[#allocation7 + $0xb0] sm:$0xff] }
  0xe5   : > { %8802 = vmatprep.subr.bf16.mxu0 %v9750_v58 }
  0xe6   : > { %v5548_v0 = vsub.f32 %v9841_v40, %v5547_v37  ;;  %v8829_v25 = vpack.c.bf16 %v5554_v52, %v5547_v37 }
  0xe8   : > { %8081 = vmatmul.mubr.f32.vlgmr.msra.gmra.mrb[0].mxu1 %v9776_v9  ;;  %v5549_v16 = vand.u32 4294901760, %v5548_v0 }
  0xe9   : > { %8632 = vmatpush3.bf16.msra.mxu1 %v8629_v8  ;;  %8087 = vmatprep.mubr.f32.mxu1 %v9755_v62  ;;  %v9871_v62 = vsub.f32 %v1846_v47, %v9854_v51  ;;  %v5961_v8 = vld [vmem:[#allocation2 + $0x1c] sm:$0xff]  ;;  %v9969_v47 = vand.u32 4294901760, %v2361_v34 }
  0xea   : > { %8634 = vmatprep.subr.bf16.mxu1 %v9780_v2  ;;  %v8817_v20 = vpack.c.bf16 %v5556_v60, %v5549_v16  ;;  %v5967_v28 = vsel %vm231_vm1, %v5961_v8, 0 }
  0xeb   : > { %8382 = vmatmul.mubr.f32.vlgmr.msra.gmra.mrb[0].mxu0 %v9769_v5  ;;  %v9885_v5 = vsub.f32 %v5455_v50, %v9862_v55  ;;  %v1920_v11 = vand.u32 4294901760, %v9871_v62  ;;  %v6069_v50 = vand.u32 4294901760, %v9960_v39 }
  0xec   : > { %8804 = vmatpush3.bf16.msra.mxu0 %v9750_v58  ;;  %8388 = vmatprep.mubr.f32.mxu0 %v5011_v61  ;;  %v5526_v61 = vand.u32 4294901760, %v9850_v49 }
  0xed   : > { %8806 = vmatprep.subr.bf16.mxu0 %v8805_v27  ;;  %v1921_v18 = vsub.f32 %v9871_v62, %v1920_v11  ;;  %v6070_v1 = vsub.f32 %v9960_v39, %v6069_v50 }
  0xee   : > { %v5527_v6 = vsub.f32 %v9850_v49, %v5526_v61 }
  0xf0   : > { %8088 = vmatmul.mubr.f32.vlgmr.msra.gmra.mrb[0].mxu1 %v9791_v17  ;;  %v5528_v15 = vand.u32 4294901760, %v5527_v6 }
  0xf1   : > { %8636 = vmatpush3.bf16.msra.mxu1 %v9780_v2  ;;  %8094 = vmatprep.mubr.f32.mxu1 %v1405_v10  ;;  %v9892_v10 = vand.u32 4294901760, %v1849_v63 }
  0xf2   : > { %8638 = vmatprep.subr.bf16.mxu1 %v8637_v32 }
  0xf3   : > { %8389 = vmatmul.mubr.f32.vlgmr.msra.gmra.mrb[0].mxu0 %v5021_v14  ;;  %v5536_v14 = vand.u32 4294901760, %v9885_v5  ;;  %v9907_v17 = vsub.f32 %v1849_v63, %v9892_v10 }
  0xf4   : > { %8808 = vmatpush3.bf16.msra.mxu0 %v8805_v27  ;;  %8395 = vmatprep.mubr.f32.mxu0 %v9720_v42  ;;  %v5973_v27 = vand.u32 4294901760, %v5964_v59 }
  0xf5   : > { %8810 = vmatprep.subr.bf16.mxu0 %v9750_v58  ;;  %v5537_v24 = vsub.f32 %v9885_v5, %v5536_v14 }
  0xf6   : > { %v9958_v35 = vsub.f32 %v5964_v59, %v5973_v27 }
  0xf7   : > { %v5538_v13 = vand.u32 4294901760, %v5537_v24 }
  0xf8   : > { %8095 = vmatmul.mubr.f32.vlgmr.msra.gmra.mrb[0].mxu1 %v1415_v53 }
  0xf9   : > { %8640 = vmatpush3.bf16.msra.mxu1 %v8637_v32  ;;  %8101 = vmatprep.mubr.f32.mxu1 %v9738_v38  ;;  %v9952_v32 = vand.u32 4294901760, %v5967_v28 }
  0xfa   : > { %8642 = vmatprep.subr.bf16.mxu1 %v9780_v2 }
  0xfb   : > { %8396 = vmatmul.mubr.f32.vlgmr.msra.gmra.mrb[0].mxu0 %v9746_v57  ;;  %v9966_v43 = vsub.f32 %v5967_v28, %v9952_v32  ;;  %v2874_v28 = vld [vmem:[#allocation7 + $0x58] sm:$0xff] }
  0xfc   : > { %8812 = vmatpush3.bf16.msra.mxu0 %v9750_v58  ;;  %8402 = vmatprep.mubr.f32.mxu0 %v9720_v42  ;;  %v1942_v58 = vsub.f32 %v9858_v44, %v1941_v3  ;;  %v1949_v42 = vsub.f32 %v9860_v45, %v1948_v4 }
  0xfd   : > { %8814 = vmatprep.subr.bf16.mxu0 %v9866_v56  ;;  %v6041_v54 = vand.u32 4294901760, %v9966_v43 }
  0xfe   : > { %v1943_v21 = vand.u32 4294901760, %v1942_v58  ;;  %v1950_v22 = vand.u32 4294901760, %v1949_v42  ;;  %v6071_v58 = vand.u32 4294901760, %v6070_v1 }
  0xff   : > { %v6042_v6 = vsub.f32 %v9966_v43, %v6041_v54 }
 0x100   : > { %8102 = vmatmul.mubr.f32.vlgmr.msra.gmra.mrb[0].mxu1 %v9776_v9  ;;  %v8649_v53 = vpack.c.bf16 %v1950_v22, %v1943_v21 }
 0x101   : > { %8644 = vmatpush3.bf16.msra.mxu1 %v9780_v2  ;;  %8108 = vmatprep.mubr.f32.mxu1 %v9738_v38  ;;  %v1930_v38 = vand.u32 4294901760, %v9907_v17  ;;  %v1922_v2 = vand.u32 4294901760, %v1921_v18 }
 0x102   : > { %8646 = vmatprep.subr.bf16.mxu1 %v9896_v48 }
 0x103   : > { %8403 = vmatmul.mubr.f32.vlgmr.msra.gmra.mrb[0].mxu0 %v9746_v57  ;;  %v1931_v23 = vsub.f32 %v9907_v17, %v1930_v38  ;;  %v8821_v57 = vpack.c.bf16 %v9843_v41, %v9841_v40  ;;  %v2367_v40 = vand.u32 4294901760, %v2358_v30  ;;  %v2370_v41 = vand.u32 4294901760, %v2359_v31 }
 0x104   : > { %8816 = vmatpush3.bf16.msra.mxu0 %v9866_v56  ;;  %8409 = vmatprep.mubr.f32.mxu0 %v5528_v15  ;;  %v6043_v15 = vand.u32 4294901760, %v6042_v6 }
 0x105   : > { %8818 = vmatprep.subr.bf16.mxu0 %v8817_v20  ;;  %v1932_v12 = vand.u32 4294901760, %v1931_v23  ;;  %v9974_v37 = vsub.f32 %v2358_v30, %v2367_v40  ;;  %v9976_v52 = vsub.f32 %v2359_v31, %v2370_v41  ;;  %v10012_v42 = vpack.c.bf16 %v2370_v41, %v2367_v40 }
 0x106   : > { %v6485_v40 = vsel %vm231_vm1, %v6477_v29, 0 }
 0x107   : > { %v2456_v3 = vand.u32 4294901760, %v9974_v37  ;;  %v2463_v4 = vand.u32 4294901760, %v9976_v52 }
 0x108   : > { %8109 = vmatmul.mubr.f32.vlgmr.msra.gmra.mrb[0].mxu1 %v9776_v9  ;;  %v8653_v9 = vpack.c.bf16 %v9860_v45, %v9858_v44  ;;  %v2356_v44 = vld [vmem:[#allocation2 + $0xc] sm:$0xff]  ;;  %v9978_v45 = vand.u32 4294901760, %v5970_v46 }
 0x109   : > { %8648 = vmatpush3.bf16.msra.mxu1 %v9896_v48  ;;  %8115 = vmatprep.mubr.f32.mxu1 %v1922_v2  ;;  %v2364_v63 = vsel %vm231_vm1, %v2356_v44, 0  ;;  %v8685_v8 = vpack.c.bf16 %v2463_v4, %v2456_v3 }
 0x10a   : > { %8650 = vmatprep.subr.bf16.mxu1 %v8649_v53 }
 0x10b   : > { %8410 = vmatmul.mubr.f32.vlgmr.msra.gmra.mrb[0].mxu0 %v5538_v13 }
 0x10c   : > { %8820 = vmatpush3.bf16.msra.mxu0 %v8817_v20  ;;  %8416 = vmatprep.mubr.f32.mxu0 %v9836_v36 }
 0x10d   : > { %8822 = vmatprep.subr.bf16.mxu0 %v8821_v57 }
 0x110   : > { %8116 = vmatmul.mubr.f32.vlgmr.msra.gmra.mrb[0].mxu1 %v1932_v12  ;;  %v6480_v12 = vld [vmem:[#allocation7 + $0xc8] sm:$0xff] }
 0x111   : > { %8652 = vmatpush3.bf16.msra.mxu1 %v8649_v53  ;;  %8122 = vmatprep.mubr.f32.mxu1 %v9854_v51  ;;  %v6491_v59 = vand.u32 4294901760, %v6480_v12 }
 0x112   : > { %8654 = vmatprep.subr.bf16.mxu1 %v8653_v9 }
 0x113   : > { %8417 = vmatmul.mubr.f32.vlgmr.msra.gmra.mrb[0].mxu0 %v9862_v55  ;;  %v10076_v33 = vsub.f32 %v6480_v12, %v6491_v59 }
 0x114   : > { %8824 = vmatpush3.bf16.msra.mxu0 %v8821_v57  ;;  %8423 = vmatprep.mubr.f32.mxu0 %v9850_v49  ;;  %v6062_v49 = vand.u32 4294901760, %v9958_v35  ;;  %v6479_v57 = vld [vmem:[#allocation7 + $0xc0] sm:$0xff] }
 0x115   : > { %8826 = vmatprep.subr.bf16.mxu0 %v9866_v56 }
 0x116   : > { %v6063_v0 = vsub.f32 %v9958_v35, %v6062_v49  ;;  %v8853_v23 = vpack.c.bf16 %v6069_v50, %v6062_v49 }
 0x118   : > { %8123 = vmatmul.mubr.f32.vlgmr.msra.gmra.mrb[0].mxu1 %v9892_v10  ;;  %v6064_v60 = vand.u32 4294901760, %v6063_v0 }
 0x119   : > { %8656 = vmatpush3.bf16.msra.mxu1 %v8653_v9  ;;  %8129 = vmatprep.mubr.f32.mxu1 %v9871_v62  ;;  %v9987_v62 = vpack.c.bf16 %v5976_v7, %v5973_v27  ;;  %v6476_v9 = vld [vmem:[#allocation2 + $0x1d] sm:$0xff]  ;;  %v2870_v27 = vld [vmem:[#allocation2 + $0x5] sm:$0xff] }
 0x11a   : > { %8658 = vmatprep.subr.bf16.mxu1 %v9896_v48  ;;  %v8841_v20 = vpack.c.bf16 %v6071_v58, %v6064_v60  ;;  %v6482_v26 = vsel %vm231_vm1, %v6476_v9, 0  ;;  %v2873_v7 = vld [vmem:[#allocation7 + $0x50] sm:$0xff]  ;;  %v2876_v30 = vsel %vm231_vm1, %v2870_v27, 0 }
 0x11b   : > { %8424 = vmatmul.mubr.f32.vlgmr.msra.gmra.mrb[0].mxu0 %v9885_v5  ;;  %v10001_v5 = vsub.f32 %v5970_v46, %v9978_v45  ;;  %v10085_v41 = vand.u32 4294901760, %v2876_v30  ;;  %v6584_v46 = vand.u32 4294901760, %v10076_v33  ;;  %v6992_v27 = vld [vmem:[#allocation2 + $0x26] sm:$0xff] }
 0x11c   : > { %8828 = vmatpush3.bf16.msra.mxu0 %v9866_v56  ;;  %8430 = vmatprep.mubr.f32.mxu0 %v5526_v61  ;;  %v9984_v61 = vsub.f32 %v2361_v34, %v9969_v47  ;;  %v2882_v34 = vand.u32 4294901760, %v2873_v7 }
 0x11d   : > { %8830 = vmatprep.subr.bf16.mxu0 %v8829_v25  ;;  %v6585_v1 = vsub.f32 %v10076_v33, %v6584_v46 }
 0x11e   : > { %v2435_v16 = vand.u32 4294901760, %v9984_v61  ;;  %v10090_v49 = vsub.f32 %v2873_v7, %v2882_v34 }
 0x120   : > { %8130 = vmatmul.mubr.f32.vlgmr.msra.gmra.mrb[0].mxu1 %v9907_v17  ;;  %v2436_v18 = vsub.f32 %v9984_v61, %v2435_v16 }
 0x121   : > { %8660 = vmatpush3.bf16.msra.mxu1 %v9896_v48  ;;  %8136 = vmatprep.mubr.f32.mxu1 %v1920_v11  ;;  %v10008_v11 = vand.u32 4294901760, %v2364_v63 }
 0x122   : > { %8662 = vmatprep.subr.bf16.mxu1 %v8661_v19 }
 0x123   : > { %8431 = vmatmul.mubr.f32.vlgmr.msra.gmra.mrb[0].mxu0 %v5536_v14  ;;  %v6051_v14 = vand.u32 4294901760, %v10001_v5  ;;  %v10023_v17 = vsub.f32 %v2364_v63, %v10008_v11 }
 0x124   : > { %8832 = vmatpush3.bf16.msra.mxu0 %v8829_v25  ;;  %8437 = vmatprep.mubr.f32.mxu0 %v9836_v36  ;;  %v6488_v25 = vand.u32 4294901760, %v6479_v57 }
 0x125   : > { %8834 = vmatprep.subr.bf16.mxu0 %v9866_v56  ;;  %v6052_v24 = vsub.f32 %v10001_v5, %v6051_v14 }
 0x126   : > { %v10074_v31 = vsub.f32 %v6479_v57, %v6488_v25 }
 0x127   : > { %v6053_v2 = vand.u32 4294901760, %v6052_v24 }
 0x128   : > { %8137 = vmatmul.mubr.f32.vlgmr.msra.gmra.mrb[0].mxu1 %v1930_v38 }
 0x129   : > { %8664 = vmatpush3.bf16.msra.mxu1 %v8661_v19  ;;  %8143 = vmatprep.mubr.f32.mxu1 %v9854_v51  ;;  %v10068_v19 = vand.u32 4294901760, %v6482_v26 }
 0x12a   : > { %8666 = vmatprep.subr.bf16.mxu1 %v9896_v48 }
 0x12b   : > { %8438 = vmatmul.mubr.f32.vlgmr.msra.gmra.mrb[0].mxu0 %v9862_v55 }
 0x12c   : > { %8836 = vmatpush3.bf16.msra.mxu0 %v9866_v56  ;;  %8444 = vmatprep.mubr.f32.mxu0 %v9836_v36  ;;  %v2457_v56 = vsub.f32 %v9974_v37, %v2456_v3  ;;  %v2464_v36 = vsub.f32 %v9976_v52, %v2463_v4  ;;  %v2971_v3 = vand.u32 4294901760, %v10090_v49 }
 0x12d   : > { %8838 = vmatprep.subr.bf16.mxu0 %v9987_v62 }
 0x12e   : > { %v2458_v21 = vand.u32 4294901760, %v2457_v56  ;;  %v2465_v22 = vand.u32 4294901760, %v2464_v36  ;;  %v6586_v56 = vand.u32 4294901760, %v6585_v1 }
 0x130   : > { %8144 = vmatmul.mubr.f32.vlgmr.msra.gmra.mrb[0].mxu1 %v9892_v10  ;;  %v8673_v38 = vpack.c.bf16 %v2465_v22, %v2458_v21 }
 0x131   : > { %8668 = vmatpush3.bf16.msra.mxu1 %v9896_v48  ;;  %8150 = vmatprep.mubr.f32.mxu1 %v9854_v51  ;;  %v2445_v51 = vand.u32 4294901760, %v10023_v17  ;;  %v2437_v48 = vand.u32 4294901760, %v2436_v18 }
 0x132   : > { %8670 = vmatprep.subr.bf16.mxu1 %v10012_v42 }
 0x133   : > { %8445 = vmatmul.mubr.f32.vlgmr.msra.gmra.mrb[0].mxu0 %v9862_v55  ;;  %v2446_v53 = vsub.f32 %v10023_v17, %v2445_v51  ;;  %v8845_v55 = vpack.c.bf16 %v9960_v39, %v9958_v35  ;;  %v2885_v35 = vand.u32 4294901760, %v2874_v28  ;;  %v10082_v39 = vsub.f32 %v6482_v26, %v10068_v19  ;;  %v3389_v26 = vld [vmem:[#allocation7 + $0x68] sm:$0xff] }
 0x134   : > { %8840 = vmatpush3.bf16.msra.mxu0 %v9987_v62  ;;  %8451 = vmatprep.mubr.f32.mxu0 %v6043_v15 }
 0x135   : > { %8842 = vmatprep.subr.bf16.mxu0 %v8841_v20  ;;  %v2447_v13 = vand.u32 4294901760, %v2446_v53  ;;  %v10092_v50 = vsub.f32 %v2874_v28, %v2885_v35  ;;  %v6556_v44 = vand.u32 4294901760, %v10082_v39  ;;  %v10128_v36 = vpack.c.bf16 %v2885_v35, %v2882_v34 }
 0x136   : > { %v7000_v34 = vsel %vm231_vm1, %v6992_v27, 0 }
 0x137   : > { %v2978_v4 = vand.u32 4294901760, %v10092_v50  ;;  %v6557_v6 = vsub.f32 %v10082_v39, %v6556_v44 }
 0x138   : > { %8151 = vmatmul.mubr.f32.vlgmr.msra.gmra.mrb[0].mxu1 %v9892_v10  ;;  %v8677_v10 = vpack.c.bf16 %v9976_v52, %v9974_v37  ;;  %v2871_v37 = vld [vmem:[#allocation2 + $0xd] sm:$0xff]  ;;  %v10094_v52 = vand.u32 4294901760, %v6485_v40 }
 0x139   : > { %8672 = vmatpush3.bf16.msra.mxu1 %v10012_v42  ;;  %8157 = vmatprep.mubr.f32.mxu1 %v2437_v48  ;;  %v2879_v63 = vsel %vm231_vm1, %v2871_v37, 0  ;;  %v6558_v15 = vand.u32 4294901760, %v6557_v6  ;;  %v8709_v9 = vpack.c.bf16 %v2978_v4, %v2971_v3 }
 0x13a   : > { %8674 = vmatprep.subr.bf16.mxu1 %v8673_v38 }
 0x13b   : > { %8452 = vmatmul.mubr.f32.vlgmr.msra.gmra.mrb[0].mxu0 %v6053_v2 }
 0x13c   : > { %8844 = vmatpush3.bf16.msra.mxu0 %v8841_v20  ;;  %8458 = vmatprep.mubr.f32.mxu0 %v9952_v32 }
 0x13d   : > { %8846 = vmatprep.subr.bf16.mxu0 %v8845_v55 }
 0x140   : > { %8158 = vmatmul.mubr.f32.vlgmr.msra.gmra.mrb[0].mxu1 %v2447_v13  ;;  %v6995_v13 = vld [vmem:[#allocation7 + $0xd8] sm:$0xff] }
 0x141   : > { %8676 = vmatpush3.bf16.msra.mxu1 %v8673_v38  ;;  %8164 = vmatprep.mubr.f32.mxu1 %v9969_v47  ;;  %v7006_v57 = vand.u32 4294901760, %v6995_v13 }
 0x142   : > { %8678 = vmatprep.subr.bf16.mxu1 %v8677_v10 }
 0x143   : > { %8459 = vmatmul.mubr.f32.vlgmr.msra.gmra.mrb[0].mxu0 %v9978_v45  ;;  %v10192_v29 = vsub.f32 %v6995_v13, %v7006_v57 }
 0x144   : > { %8848 = vmatpush3.bf16.msra.mxu0 %v8845_v55  ;;  %8465 = vmatprep.mubr.f32.mxu0 %v9966_v43  ;;  %v6577_v43 = vand.u32 4294901760, %v10074_v31  ;;  %v6994_v55 = vld [vmem:[#allocation7 + $0xd0] sm:$0xff] }
 0x145   : > { %8850 = vmatprep.subr.bf16.mxu0 %v9987_v62 }
 0x146   : > { %v6578_v0 = vsub.f32 %v10074_v31, %v6577_v43  ;;  %v8877_v53 = vpack.c.bf16 %v6584_v46, %v6577_v43 }
 0x148   : > { %8165 = vmatmul.mubr.f32.vlgmr.msra.gmra.mrb[0].mxu1 %v10008_v11  ;;  %v6579_v58 = vand.u32 4294901760, %v6578_v0 }
 0x149   : > { %8680 = vmatpush3.bf16.msra.mxu1 %v8677_v10  ;;  %8171 = vmatprep.mubr.f32.mxu1 %v9984_v61  ;;  %v10103_v61 = vpack.c.bf16 %v6491_v59, %v6488_v25  ;;  %v6991_v10 = vld [vmem:[#allocation2 + $0x1e] sm:$0xff]  ;;  %v3385_v25 = vld [vmem:[#allocation2 + $0x6] sm:$0xff]  ;;  %v3388_v59 = vld [vmem:[#allocation7 + $0x60] sm:$0xff] }
 0x14a   : > { %8682 = vmatprep.subr.bf16.mxu1 %v10012_v42  ;;  %v8865_v20 = vpack.c.bf16 %v6586_v56, %v6579_v58  ;;  %v6997_v12 = vsel %vm231_vm1, %v6991_v10, 0  ;;  %v3391_v7 = vsel %vm231_vm1, %v3385_v25, 0 }
 0x14b   : > { %8466 = vmatmul.mubr.f32.vlgmr.msra.gmra.mrb[0].mxu0 %v10001_v5  ;;  %v10117_v5 = vsub.f32 %v6485_v40, %v10094_v52  ;;  %v10201_v35 = vand.u32 4294901760, %v3391_v7  ;;  %v7099_v40 = vand.u32 4294901760, %v10192_v29 }
 0x14c   : > { %8852 = vmatpush3.bf16.msra.mxu0 %v9987_v62  ;;  %8472 = vmatprep.mubr.f32.mxu0 %v6041_v54  ;;  %v10100_v54 = vsub.f32 %v2876_v30, %v10085_v41  ;;  %v3397_v30 = vand.u32 4294901760, %v3388_v59 }
 0x14d   : > { %8854 = vmatprep.subr.bf16.mxu0 %v8853_v23  ;;  %v7100_v1 = vsub.f32 %v10192_v29, %v7099_v40 }
 0x14e   : > { %v2950_v60 = vand.u32 4294901760, %v10100_v54  ;;  %v10206_v43 = vsub.f32 %v3388_v59, %v3397_v30 }
 0x150   : > { %8172 = vmatmul.mubr.f32.vlgmr.msra.gmra.mrb[0].mxu1 %v10023_v17  ;;  %v2951_v18 = vsub.f32 %v10100_v54, %v2950_v60 }
 0x151   : > { %8684 = vmatpush3.bf16.msra.mxu1 %v10012_v42  ;;  %8178 = vmatprep.mubr.f32.mxu1 %v2435_v16  ;;  %v10124_v16 = vand.u32 4294901760, %v2879_v63 }
 0x152   : > { %8686 = vmatprep.subr.bf16.mxu1 %v8685_v8 }
 0x153   : > { %8473 = vmatmul.mubr.f32.vlgmr.msra.gmra.mrb[0].mxu0 %v6051_v14  ;;  %v6566_v14 = vand.u32 4294901760, %v10117_v5  ;;  %v10139_v17 = vsub.f32 %v2879_v63, %v10124_v16 }
 0x154   : > { %8856 = vmatpush3.bf16.msra.mxu0 %v8853_v23  ;;  %8479 = vmatprep.mubr.f32.mxu0 %v9952_v32  ;;  %v7003_v23 = vand.u32 4294901760, %v6994_v55 }
 0x155   : > { %8858 = vmatprep.subr.bf16.mxu0 %v9987_v62  ;;  %v6567_v24 = vsub.f32 %v10117_v5, %v6566_v14 }
 0x156   : > { %v10190_v28 = vsub.f32 %v6994_v55, %v7003_v23 }
 0x157   : > { %v6568_v48 = vand.u32 4294901760, %v6567_v24 }
 0x158   : > { %8179 = vmatmul.mubr.f32.vlgmr.msra.gmra.mrb[0].mxu1 %v2445_v51 }
 0x159   : > { %8688 = vmatpush3.bf16.msra.mxu1 %v8685_v8  ;;  %8185 = vmatprep.mubr.f32.mxu1 %v9969_v47  ;;  %v10184_v8 = vand.u32 4294901760, %v6997_v12 }
 0x15a   : > { %8690 = vmatprep.subr.bf16.mxu1 %v10012_v42 }
 0x15b   : > { %8480 = vmatmul.mubr.f32.vlgmr.msra.gmra.mrb[0].mxu0 %v9978_v45 }
 0x15c   : > { %8860 = vmatpush3.bf16.msra.mxu0 %v9987_v62  ;;  %8486 = vmatprep.mubr.f32.mxu0 %v9952_v32  ;;  %v2972_v62 = vsub.f32 %v10090_v49, %v2971_v3  ;;  %v2979_v32 = vsub.f32 %v10092_v50, %v2978_v4  ;;  %v3486_v3 = vand.u32 4294901760, %v10206_v43 }
 0x15d   : > { %8862 = vmatprep.subr.bf16.mxu0 %v10103_v61 }
 0x15e   : > { %v2973_v21 = vand.u32 4294901760, %v2972_v62  ;;  %v2980_v22 = vand.u32 4294901760, %v2979_v32  ;;  %v7101_v62 = vand.u32 4294901760, %v7100_v1 }
 0x160   : > { %8186 = vmatmul.mubr.f32.vlgmr.msra.gmra.mrb[0].mxu1 %v10008_v11  ;;  %v8697_v51 = vpack.c.bf16 %v2980_v22, %v2973_v21 }
 0x161   : > { %8692 = vmatpush3.bf16.msra.mxu1 %v10012_v42  ;;  %8192 = vmatprep.mubr.f32.mxu1 %v9969_v47  ;;  %v2960_v47 = vand.u32 4294901760, %v10139_v17  ;;  %v2952_v42 = vand.u32 4294901760, %v2951_v18 }
 0x162   : > { %8694 = vmatprep.subr.bf16.mxu1 %v10128_v36 }
 0x163   : > { %8487 = vmatmul.mubr.f32.vlgmr.msra.gmra.mrb[0].mxu0 %v9978_v45  ;;  %v2961_v38 = vsub.f32 %v10139_v17, %v2960_v47  ;;  %v8869_v45 = vpack.c.bf16 %v10076_v33, %v10074_v31  ;;  %v3400_v31 = vand.u32 4294901760, %v3389_v26  ;;  %v10198_v33 = vsub.f32 %v6997_v12, %v10184_v8 }
 0x164   : > { %8864 = vmatpush3.bf16.msra.mxu0 %v10103_v61  ;;  %8493 = vmatprep.mubr.f32.mxu0 %v6558_v15 }
 0x165   : > { %8866 = vmatprep.subr.bf16.mxu0 %v8865_v20  ;;  %v2962_v2 = vand.u32 4294901760, %v2961_v38  ;;  %v10208_v46 = vsub.f32 %v3389_v26, %v3400_v31  ;;  %v7071_v37 = vand.u32 4294901760, %v10198_v33  ;;  %v10244_v32 = vpack.c.bf16 %v3400_v31, %v3397_v30 }
 0x167   : > { %v3493_v4 = vand.u32 4294901760, %v10208_v46  ;;  %v7072_v6 = vsub.f32 %v10198_v33, %v7071_v37  ;;  %v8725_v38 = vpack.c.bf16 %v10208_v46, %v10206_v43 }
 0x168   : > { %8193 = vmatmul.mubr.f32.vlgmr.msra.gmra.mrb[0].mxu1 %v10008_v11  ;;  %v8701_v11 = vpack.c.bf16 %v10092_v50, %v10090_v49  ;;  %v3386_v49 = vld [vmem:[#allocation2 + $0xe] sm:$0xff]  ;;  %v10210_v50 = vand.u32 4294901760, %v7000_v34 }
 0x169   : > { %8696 = vmatpush3.bf16.msra.mxu1 %v10128_v36  ;;  %8199 = vmatprep.mubr.f32.mxu1 %v2952_v42  ;;  %v3394_v63 = vsel %vm231_vm1, %v3386_v49, 0  ;;  %v7073_v15 = vand.u32 4294901760, %v7072_v6 }
 0x16a   : > { %8698 = vmatprep.subr.bf16.mxu1 %v8697_v51 }
 0x16b   : > { %8494 = vmatmul.mubr.f32.vlgmr.msra.gmra.mrb[0].mxu0 %v6568_v48  ;;  %v8893_v48 = vpack.c.bf16 %v10192_v29, %v10190_v28 }
 0x16c   : > { %8868 = vmatpush3.bf16.msra.mxu0 %v8865_v20  ;;  %8500 = vmatprep.mubr.f32.mxu0 %v10068_v19 }
 0x16d   : > { %8870 = vmatprep.subr.bf16.mxu0 %v8869_v45 }
 0x170   : > { %8200 = vmatmul.mubr.f32.vlgmr.msra.gmra.mrb[0].mxu1 %v2962_v2 }
 0x171   : > { %8700 = vmatpush3.bf16.msra.mxu1 %v8697_v51  ;;  %8206 = vmatprep.mubr.f32.mxu1 %v10085_v41 }
 0x172   : > { %8702 = vmatprep.subr.bf16.mxu1 %v8701_v11 }
 0x173   : > { %8501 = vmatmul.mubr.f32.vlgmr.msra.gmra.mrb[0].mxu0 %v10094_v52 }
 0x174   : > { %8872 = vmatpush3.bf16.msra.mxu0 %v8869_v45  ;;  %8507 = vmatprep.mubr.f32.mxu0 %v10082_v39  ;;  %v7092_v39 = vand.u32 4294901760, %v10190_v28  ;;  %v8733_v45 = vpack.c.bf16 %v3493_v4, %v3486_v3 }
 0x175   : > { %8874 = vmatprep.subr.bf16.mxu0 %v10103_v61 }
 0x176   : > { %v7093_v0 = vsub.f32 %v10190_v28, %v7092_v39 }
 0x178   : > { %8207 = vmatmul.mubr.f32.vlgmr.msra.gmra.mrb[0].mxu1 %v10124_v16  ;;  %v7094_v56 = vand.u32 4294901760, %v7093_v0 }
 0x179   : > { %8704 = vmatpush3.bf16.msra.mxu1 %v8701_v11  ;;  %8213 = vmatprep.mubr.f32.mxu1 %v10100_v54  ;;  %v10219_v54 = vpack.c.bf16 %v7006_v57, %v7003_v23 }
 0x17a   : > { %8706 = vmatprep.subr.bf16.mxu1 %v10128_v36  ;;  %v8889_v20 = vpack.c.bf16 %v7101_v62, %v7094_v56 }
 0x17b   : > { %8508 = vmatmul.mubr.f32.vlgmr.msra.gmra.mrb[0].mxu0 %v10117_v5  ;;  %v10233_v5 = vsub.f32 %v7000_v34, %v10210_v50 }
 0x17c   : > { %8876 = vmatpush3.bf16.msra.mxu0 %v10103_v61  ;;  %8514 = vmatprep.mubr.f32.mxu0 %v6556_v44  ;;  %v10216_v44 = vsub.f32 %v3391_v7, %v10201_v35 }
 0x17d   : > { %8878 = vmatprep.subr.bf16.mxu0 %v8877_v53 }
 0x17e   : > { %v3465_v58 = vand.u32 4294901760, %v10216_v44 }
 0x180   : > { %8214 = vmatmul.mubr.f32.vlgmr.msra.gmra.mrb[0].mxu1 %v10139_v17  ;;  %v3466_v18 = vsub.f32 %v10216_v44, %v3465_v58 }
 0x181   : > { %8708 = vmatpush3.bf16.msra.mxu1 %v10128_v36  ;;  %8220 = vmatprep.mubr.f32.mxu1 %v2950_v60  ;;  %v10240_v60 = vand.u32 4294901760, %v3394_v63 }
 0x182   : > { %8710 = vmatprep.subr.bf16.mxu1 %v8709_v9  ;;  %v3467_v42 = vand.u32 4294901760, %v3466_v18 }
 0x183   : > { %8515 = vmatmul.mubr.f32.vlgmr.msra.gmra.mrb[0].mxu0 %v6566_v14  ;;  %v7081_v14 = vand.u32 4294901760, %v10233_v5  ;;  %v3474_v17 = vsub.f32 %v3394_v63, %v10240_v60 }
 0x184   : > { %8880 = vmatpush3.bf16.msra.mxu0 %v8877_v53  ;;  %8521 = vmatprep.mubr.f32.mxu0 %v10068_v19  ;;  %v295_v53 = vstv %s294_s21 }
 0x185   : > { %8882 = vmatprep.subr.bf16.mxu0 %v10103_v61  ;;  %v7082_v24 = vsub.f32 %v10233_v5, %v7081_v14 }
 0x187   : > { %v7083_v51 = vand.u32 4294901760, %v7082_v24 }
 0x188   : > { %8221 = vmatmul.mubr.f32.vlgmr.msra.gmra.mrb[0].mxu1 %v2960_v47  ;;  %v3475_v47 = vand.u32 4294901760, %v3474_v17 }
 0x189   : > { %8712 = vmatpush3.bf16.msra.mxu1 %v8709_v9  ;;  %8227 = vmatprep.mubr.f32.mxu1 %v10085_v41 }
 0x18a   : > { %8714 = vmatprep.subr.bf16.mxu1 %v10128_v36 }
 0x18b   : > { %8522 = vmatmul.mubr.f32.vlgmr.msra.gmra.mrb[0].mxu0 %v10094_v52 }
 0x18c   : > { %8884 = vmatpush3.bf16.msra.mxu0 %v10103_v61  ;;  %8528 = vmatprep.mubr.f32.mxu0 %v10068_v19  ;;  %v3487_v61 = vsub.f32 %v10206_v43, %v3486_v3  ;;  %v3494_v19 = vsub.f32 %v10208_v46, %v3493_v4 }
 0x18d   : > { %8886 = vmatprep.subr.bf16.mxu0 %v10219_v54 }
 0x18e   : > { %v3488_v21 = vand.u32 4294901760, %v3487_v61  ;;  %v3495_v22 = vand.u32 4294901760, %v3494_v19 }
 0x190   : > { %8228 = vmatmul.mubr.f32.vlgmr.msra.gmra.mrb[0].mxu1 %v10124_v16 }
 0x191   : > { %8716 = vmatpush3.bf16.msra.mxu1 %v10128_v36  ;;  %8234 = vmatprep.mubr.f32.mxu1 %v10085_v41  ;;  %v8721_v36 = vpack.c.bf16 %v3495_v22, %v3488_v21  ;;  %v3476_v41 = vsub.f32 %v3474_v17, %v3475_v47 }
 0x192   : > { %8718 = vmatprep.subr.bf16.mxu1 %v10244_v32 }
 0x193   : > { %8529 = vmatmul.mubr.f32.vlgmr.msra.gmra.mrb[0].mxu0 %v10094_v52  ;;  %v3477_v52 = vand.u32 4294901760, %v3476_v41 }
 0x194   : > { %8888 = vmatpush3.bf16.msra.mxu0 %v10219_v54  ;;  %8535 = vmatprep.mubr.f32.mxu0 %v7073_v15 }
 0x195   : > { %8890 = vmatprep.subr.bf16.mxu0 %v8889_v20 }
 0x198   : > { %8235 = vmatmul.mubr.f32.vlgmr.msra.gmra.mrb[0].mxu1 %v10124_v16  ;;  %v8901_v16 = vpack.c.bf16 %v7099_v40, %v7092_v39 }
 0x199   : > { %8720 = vmatpush3.bf16.msra.mxu1 %v10244_v32  ;;  %8241 = vmatprep.mubr.f32.mxu1 %v3467_v42 }
 0x19a   : > { %8722 = vmatprep.subr.bf16.mxu1 %v8721_v36 }
 0x19b   : > { %8536 = vmatmul.mubr.f32.vlgmr.msra.gmra.mrb[0].mxu0 %v7083_v51 }
 0x19c   : > { %8892 = vmatpush3.bf16.msra.mxu0 %v8889_v20  ;;  %8542 = vmatprep.mubr.f32.mxu0 %v10184_v8 }
 0x19d   : > { %8894 = vmatprep.subr.bf16.mxu0 %v8893_v48 }
 0x1a0   : > { %8242 = vmatmul.mubr.f32.vlgmr.msra.gmra.mrb[0].mxu1 %v3477_v52 }
 0x1a1   : > { %8724 = vmatpush3.bf16.msra.mxu1 %v8721_v36  ;;  %8248 = vmatprep.mubr.f32.mxu1 %v10201_v35 }
 0x1a2   : > { %8726 = vmatprep.subr.bf16.mxu1 %v8725_v38 }
 0x1a3   : > { %8543 = vmatmul.mubr.f32.vlgmr.msra.gmra.mrb[0].mxu0 %v10210_v50 }
 0x1a4   : > { %8896 = vmatpush3.bf16.msra.mxu0 %v8893_v48  ;;  %8549 = vmatprep.mubr.f32.mxu0 %v10198_v33 }
 0x1a5   : > { %8898 = vmatprep.subr.bf16.mxu0 %v10219_v54 }
 0x1a8   : > { %8249 = vmatmul.mubr.f32.vlgmr.msra.gmra.mrb[0].mxu1 %v10240_v60 }
 0x1a9   : > { %8728 = vmatpush3.bf16.msra.mxu1 %v8725_v38  ;;  %8255 = vmatprep.mubr.f32.mxu1 %v10216_v44 }
 0x1aa   : > { %8730 = vmatprep.subr.bf16.mxu1 %v10244_v32 }
 0x1ab   : > { %8550 = vmatmul.mubr.f32.vlgmr.msra.gmra.mrb[0].mxu0 %v10233_v5 }
 0x1ac   : > { %8900 = vmatpush3.bf16.msra.mxu0 %v10219_v54  ;;  %8556 = vmatprep.mubr.f32.mxu0 %v7071_v37 }
 0x1ad   : > { %8902 = vmatprep.subr.bf16.mxu0 %v8901_v16 }
 0x1b0   : > { %8256 = vmatmul.mubr.f32.vlgmr.msra.gmra.mrb[0].mxu1 %v3474_v17 }
 0x1b1   : > { %8732 = vmatpush3.bf16.msra.mxu1 %v10244_v32  ;;  %8262 = vmatprep.mubr.f32.mxu1 %v3465_v58 }
 0x1b2   : > { %8734 = vmatprep.subr.bf16.mxu1 %v8733_v45 }
 0x1b3   : > { %8557 = vmatmul.mubr.f32.vlgmr.msra.gmra.mrb[0].mxu0 %v7081_v14 }
 0x1b4   : > { %8904 = vmatpush3.bf16.msra.mxu0 %v8901_v16  ;;  %8563 = vmatprep.mubr.f32.mxu0 %v10184_v8 }
 0x1b5   : > { %8906 = vmatprep.subr.bf16.mxu0 %v10219_v54 }
 0x1b8   : > { %8263 = vmatmul.mubr.f32.vlgmr.msra.gmra.mrb[0].mxu1 %v3475_v47 }
 0x1b9   : > { %8736 = vmatpush3.bf16.msra.mxu1 %v8733_v45  ;;  %8269 = vmatprep.mubr.f32.mxu1 %v10201_v35 }
 0x1ba   : > { %8738 = vmatprep.subr.bf16.mxu1 %v10244_v32 }
 0x1bb   : > { %8564 = vmatmul.mubr.f32.vlgmr.msra.gmra.mrb[0].mxu0 %v10210_v50 }
 0x1bc   : > { %8908 = vmatpush3.bf16.msra.mxu0 %v10219_v54  ;;  %8570 = vmatprep.mubr.f32.mxu0 %v10184_v8 }
 0x1c0   : > { %8270 = vmatmul.mubr.f32.vlgmr.msra.gmra.mrb[0].mxu1 %v10240_v60 }
 0x1c1   : > { %8740 = vmatpush3.bf16.msra.mxu1 %v10244_v32  ;;  %8276 = vmatprep.mubr.f32.mxu1 %v10201_v35 }
 0x1c3   : > { %8571 = vmatmul.mubr.f32.vlgmr.msra.gmra.mrb[0].mxu0 %v10210_v50 }
 0x1c8   : > { %8277 = vmatmul.mubr.f32.vlgmr.msra.gmra.mrb[0].mxu1 %v10240_v60 }
 0x296   : > { %v8572_v2 = vpop.f32.mrb[0].mxu0 }
 0x297   : > { %v7494_v11 = vpop.f32.mrb[1].mxu0 }
 0x29b   : > { %v8278_v55 = vpop.f32.mrb[0].mxu1 }
 0x29c   : > { %v8909_v13 = vadd.f32 %v8278_v55, %v295_v53  ;;  %v3888_v10 = vpop.f32.mrb[1].mxu1 }
 0x29d   : > { %v8911_v23 = vadd.f32 %v3888_v10, %v295_v53 }
 0x29e   : > { %v8910_v57 = vadd.f32 %v8909_v13, %v8572_v2 }
 0x29f   : > { %v8912_v12 = vadd.f32 %v8911_v23, %v7494_v11 }
 0x2a0   : > { %v7641_v9 = vmul.f32 -1.442695, %v8910_v57 }
 0x2a1   : > { %v7640_v25 = vmul.f32 -1.442695, %v8912_v12 }
 0x2a2   : > { %9155 = vpow2.f32 %v7641_v9 }
 0x2a3   : > { %9157 = vpow2.f32 %v7640_v25 }
 0x2ac   : > { %v9156_v59 = vpop.eup %9155 }
 0x2ad   : > { %v9158_v26 = vpop.eup %9157  ;;  %v7513_v8 = vadd.f32 1.0, %v9156_v59 }
 0x2ae   : > { %v7512_v27 = vadd.f32 1.0, %v9158_v26 }
 0x2af   : > { %9159 = vrcp.f32 %v7513_v8 }
 0x2b0   : > { %9161 = vrcp.f32 %v7512_v27 }
 0x2b9   : > { %v9160_v7 = vpop.eup %9159 }
 0x2ba   : > { %v9162_v28 = vpop.eup %9161  ;;  %7519 = vst.msk [vmem:[%s221_s11 + $0x8] sm:$0xff] %vm231_vm1, %v9160_v7 }
 0x2bb   : > { %7518 = vst.msk [vmem:[%s221_s11] sm:$0xff] %vm231_vm1, %v9162_v28 }
 0x2bc   : > { %9234 = shalt.err (!%p9231_p5)
}
 0x2bd   : > { %s9235_s22 = scalar_lea.hbm %s10306_s13, 256  ;;  %s9239_s26 = scalar_lea.hbm %s10362_s3, 512 }
 0x2be   : > { %p9236_p9 = scmp.ne.s32.totalorder %s10306_s13, %s9235_s22  ;;  %p9240_p3 = scmp.lt.u32.totalorder %s10306_s13, %s10362_s3 }
 0x2bf   : > { %p9241_p7 = scmp.lt.u32.totalorder %s9239_s26, %s9235_s22  ;;  %p9243_p4 = scmp.lt.u32.totalorder %s9235_s22, %s10306_s13 }
 0x2c0   : > { %p9237_p1 = pnand %p9236_p9, %p9439_p10 }
 0x2c1   : > { %p9242_p13 = por %p9241_p7, %p9240_p3 }
 0x2c2   : > { %p9238_p2 = pneg %p9237_p1 }
 0x2c3   : > { %p9244_p6 = por %p9243_p4, %p9242_p13 }
 0x2c5   : > { %p9245_p8 = pnand %p9244_p6, %p9238_p2 }
 0x2c7   : > { %9248 = shalt.err (!%p9245_p8)
}
 0x2c8   : > { %s9315_s23 = smov 128   ;;  %s9316_s25 = smov 8  }
 0x2c9   : > { %9083 = dma.vmem_to_hbm [thread:$0]  (%p9439_p10), %s10308_s12, 256, %s10306_s13, %s7521_s2, %s9315_s23, %s9315_s23, %s9316_s25  }
 0x2ca PF: > { %s7549_s11 = sand.u32 1, %s9287_s14   ;;  %p10380_p12 = scmp.ne.s32.totalorder %s10370_s24, 0 }
 0x2cb   : > { %p10381_p11 = scmp.ge.s32.totalorder %s9307_s19, 2  ;;  %s7550_s9 = scalar_lea.sflag [#allocation6], %s7549_s11 }
 0x2cd   : > { %p9094_p0 = pnand %p10381_p11, %p10380_p12 }
 0x2cf   : > { %9282 = dma.done.wait (!%p9094_p0), %s7550_s9, 256  }
 0x2d0   : > { %9284 = vsyncadd (!%p9094_p0), %s7550_s9, 4294967040  ;;  %s21_s19 = sadd.s32 1, %s9307_s19   ;;  %s10382_s14 = smov %s9291_s15 }
 0x2d1   : > { %p18_p5 = scmp.ge.s32.totalorder %s21_s19, 4   ;;  %s10383_s15 = smov %s9295_s16 }
 0x2d2   : > { %s10384_s16 = smov %s9448_s5  ;;  %s10385_s17 = smov %s9303_s18 }
 0x2d3   : > { %s10386_s18 = smov %s10388_s29  ;;  %20 = sbr.rel (!%p18_p5) target bundleno = 9 (0x9), region = 109 }
 0x2da   :  { %7555 = vsyncpa [#allocation5], 1 }
 0x2db   :  { %7557 = vsyncpa [#allocation5 + $0x1], 1 }
 0x2dc   :  { %7558 = vsyncpa [#allocation8], 1 }
 0x2dd   :  { %7559 = vsyncpa [#allocation6], 1 }
 0x2de   :  { %7561 = vsyncpa [#allocation6 + $0x1], 1 }

</bundles_post_ra>
